<compile_context>
chip_gen: v5e
topology: v5e:2x2
jax: 0.10.0
libtpu: 0.0.40
codegen_flags: <defaults>
</compile_context>

<pallas_src>
import functools

import jax
import jax.numpy as jnp
from jax import lax
from jax.experimental import pallas as pl
from jax.experimental.pallas import tpu as pltpu


# ----------------------------------------------------------------------------
# Kernel: one (batch, q-tile, k-tile) grid step.
# ----------------------------------------------------------------------------
def _flash_attn_dist_kernel(q_ref, k_ref, v_ref, dist_ref,
                            w_out_ref, b_out_ref,
                            w1_ref, b1_ref, w2_ref, b2_ref,
                            o_ref,
                            m_scr, l_scr, acc_scr, h1_scr,
                            *, heads, dim_head, approx):
    ki = pl.program_id(2)
    nk = pl.num_programs(2)

    # ---- init online-softmax state at the first key tile --------------------
    @pl.when(ki == 0)
    def _():
        m_scr[...] = jnp.full_like(m_scr, -jnp.inf)
        l_scr[...] = jnp.zeros_like(l_scr)
        acc_scr[...] = jnp.zeros_like(acc_scr)

    # ---- dist -> 3 feature maps for this (q-tile, k-tile) -------------------
    # Feature maps / statistics stay f32 even when dist arrives as bf16.
    dist = dist_ref[0].astype(jnp.float32)                  # (TQ, TK)
    d1 = dist * (1.0 / 3.8)
    d2 = d1 * d1
    d3 = d2 * d1
    f1 = pl.reciprocal(1.0 + d1, approx=approx)             # EUP slot
    f2 = pl.reciprocal(1.0 + d2, approx=approx)
    f3 = pl.reciprocal(1.0 + d3, approx=approx)

    # ---- 1x1 conv (3 -> H) + ReLU into stacked VMEM scratch ------------------
    # Writing each channel straight to scratch bounds live ranges: f1..f3 die
    # here and no h1 map has to survive the per-head loop in vregs.
    for c in range(heads):
        h1_scr[c] = jnp.maximum(
            w1_ref[c, 0] * f1 + w1_ref[c, 1] * f2 + w1_ref[c, 2] * f3
            + b1_ref[c], 0.0)

    q = q_ref[0]          # (TQ, inner), pre-scaled, compute dtype (bf16/f32)
    k = k_ref[0]          # (TK, inner)
    v = v_ref[0]          # (TK, inner)

    # ---- per-head online softmax with additive dist bias --------------------
    # Static unroll over heads (head slices are static lane offsets); all
    # cross-iteration state lives in VMEM scratch so live ranges stay bounded.
    for h in range(heads):
        hs = h * dim_head

        # 1x1 conv (H -> H): scalar-broadcast FMAs against the scratch slabs.
        bias = w2_ref[h, 0] * h1_scr[0] + b2_ref[h]
        for c in range(1, heads):
            bias = bias + w2_ref[h, c] * h1_scr[c]

        q_h = q[:, hs:hs + dim_head]                        # (TQ, D)
        k_h = k[:, hs:hs + dim_head]                        # (TK, D)
        v_h = v[:, hs:hs + dim_head]                        # (TK, D)

        dots = lax.dot_general(q_h, k_h, (((1,), (1,)), ((), ())),
                               preferred_element_type=jnp.float32)
        dots = dots + bias                                   # (TQ, TK) f32

        m_prev = m_scr[h]                                    # (TQ, 1)
        l_prev = l_scr[h]                                    # (TQ, 1)
        m_new = jnp.maximum(m_prev, jnp.max(dots, axis=-1, keepdims=True))
        alpha = jnp.exp(m_prev - m_new)
        p = jnp.exp(dots - m_new)
        l_scr[h] = alpha * l_prev + jnp.sum(p, axis=-1, keepdims=True)
        acc_scr[h] = alpha * acc_scr[h] + jnp.dot(
            p.astype(v_h.dtype), v_h, preferred_element_type=jnp.float32)
        m_scr[h] = m_new

    # ---- finalize: normalize, merge heads, fused to_out projection ----------
    @pl.when(ki == nk - 1)
    def _():
        parts = []
        for h in range(heads):
            inv_l = pl.reciprocal(l_scr[h], approx=approx)   # (TQ, 1)
            parts.append(acc_scr[h] * inv_l)
        # 'b h n d -> b n (h d)' is just a lane concat (no HBM transpose).
        out2d = jnp.concatenate(parts, axis=1)               # (TQ, inner) f32
        y = jnp.dot(out2d.astype(w_out_ref.dtype), w_out_ref[...],
                    preferred_element_type=jnp.float32)      # (TQ, dim)
        y = y + b_out_ref[...].astype(jnp.float32)           # (1, dim) bcast
        # TODO(synk): for dim < 128 a wrapper-side lane-dense packing would
        # avoid masked vst; negligible next to the N^2 work here.
        o_ref[0] = y.astype(o_ref.dtype)


# ----------------------------------------------------------------------------
# Wrapper: single pallas_call, grid (batch, q-tiles, k-tiles).
# ----------------------------------------------------------------------------
def attention_structure_forward(params, x, dist, *, heads, dim_head,
                                block_q=256, block_k=512,
                                compute_dtype=jnp.bfloat16, approx=True):
    B, N, dim = x.shape
    inner = heads * dim_head
    scale = dim_head ** -0.5

    block_q = min(block_q, N)
    block_k = min(block_k, N)
    if N % block_q:
        block_q = N   # TODO(synk): pad + key-mask for N not divisible by tile
    if N % block_k:
        block_k = N

    # to_qkv as one XLA matmul with the weight pre-transposed once (no
    # per-step in-kernel weight relayout); softmax scale folded into q.
    w_qkv_t = params['w_qkv'].T.astype(compute_dtype)        # (dim, 3*inner)
    qkv = jnp.dot(x.astype(compute_dtype), w_qkv_t,
                  preferred_element_type=jnp.float32)        # (B, N, 3*inner)
    q = (qkv[..., :inner] * scale).astype(compute_dtype)
    k = qkv[..., inner:2 * inner].astype(compute_dtype)
    v = qkv[..., 2 * inner:].astype(compute_dtype)

    w_out_t = params['w_out'].T.astype(compute_dtype)        # (inner, dim)
    b_out = params['b_out'].reshape(1, dim).astype(jnp.float32)

    grid = (B, N // block_q, N // block_k)
    smem = pl.BlockSpec(memory_space=pltpu.MemorySpace.SMEM)

    # Explicit VMEM budget (double-buffered blocks + resident weights +
    # scratch + in-flight temporaries), with headroom.
    isz = jnp.dtype(compute_dtype).itemsize
    est = (2 * block_q * block_k * dist.dtype.itemsize        # dist blocks
           + 2 * block_q * inner * isz                        # q blocks
           + 4 * block_k * inner * isz                        # k + v blocks
           + 2 * block_q * dim * x.dtype.itemsize             # out blocks
           + 2 * (inner * dim + dim) * isz                    # resident weights
           + heads * block_q * (block_k + dim_head + 2) * 4   # scratch (h1/acc/m/l)
           + 8 * block_q * block_k * 4)                       # f1..f3/dots/p temps
    vmem_limit = int(min(max(est * 1.5, 32 * 1024 * 1024), 100 * 1024 * 1024))

    kernel = functools.partial(_flash_attn_dist_kernel, heads=heads,
                               dim_head=dim_head, approx=approx)

    grid_spec = pltpu.PrefetchScalarGridSpec(
        num_scalar_prefetch=0,
        grid=grid,
        in_specs=[
            pl.BlockSpec((1, block_q, inner), lambda b, qi, ki: (b, qi, 0)),   # q
            pl.BlockSpec((1, block_k, inner), lambda b, qi, ki: (b, ki, 0)),   # k
            pl.BlockSpec((1, block_k, inner), lambda b, qi, ki: (b, ki, 0)),   # v
            pl.BlockSpec((1, block_q, block_k), lambda b, qi, ki: (b, qi, ki)),  # dist
            pl.BlockSpec((inner, dim), lambda b, qi, ki: (0, 0)),              # w_out_t
            pl.BlockSpec((1, dim), lambda b, qi, ki: (0, 0)),                  # b_out
            smem,                                                              # w_cnn1
            smem,                                                              # b_cnn1
            smem,                                                              # w_cnn2
            smem,                                                              # b_cnn2
        ],
        out_specs=pl.BlockSpec((1, block_q, dim), lambda b, qi, ki: (b, qi, 0)),
        scratch_shapes=[
            pltpu.VMEM((heads, block_q, 1), jnp.float32),           # m
            pltpu.VMEM((heads, block_q, 1), jnp.float32),           # l
            pltpu.VMEM((heads, block_q, dim_head), jnp.float32),    # acc
            pltpu.VMEM((heads, block_q, block_k), jnp.float32),     # h1 stack
        ],
    )

    return pl.pallas_call(
        kernel,
        out_shape=jax.ShapeDtypeStruct((B, N, dim), x.dtype),
        grid_spec=grid_spec,
        compiler_params=pltpu.CompilerParams(
            dimension_semantics=("parallel", "parallel", "arbitrary"),
            vmem_limit_bytes=vmem_limit),
    )(q, k, v, dist,
      w_out_t, b_out,
      params['w_cnn1'], params['b_cnn1'], params['w_cnn2'], params['b_cnn2'])


# ----------------------------------------------------------------------------
# Pure-JAX reference for the correctness checks
# ----------------------------------------------------------------------------
def reference_forward(params, x, dist, *, heads, dim_head):
    B, N, dim = x.shape
    inner = heads * dim_head
    scale = dim_head ** -0.5
    qkv = x @ params['w_qkv'].T
    q, k, v = jnp.split(qkv, 3, axis=-1)
    rs = lambda t: t.reshape(B, N, heads, dim_head).transpose(0, 2, 1, 3)
    q, k, v = rs(q), rs(k), rs(v)
    dots = jnp.einsum('bhqd,bhkd->bhqk', q, k) * scale
    d1 = dist / 3.8
    d2 = d1 * d1
    d3 = d2 * d1
    feat = jnp.stack([1 / (1 + d1), 1 / (1 + d2), 1 / (1 + d3)], axis=1)
    h1 = (jnp.einsum('oc,bcij->boij', params['w_cnn1'], feat)
          + params['b_cnn1'][None, :, None, None])
    h1 = jnp.maximum(h1, 0.0)
    bias = (jnp.einsum('oc,bcij->boij', params['w_cnn2'], h1)
            + params['b_cnn2'][None, :, None, None])
    dots = dots + bias
    attn = jax.nn.softmax(dots, axis=-1)
    out = jnp.einsum('bhqk,bhkd->bhqd', attn, v)
    out = out.transpose(0, 2, 1, 3).reshape(B, N, inner)
    return out @ params['w_out'].T + params['b_out']


def _make_params(key, dim, heads, dim_head):
    inner = heads * dim_head
    ks = jax.random.split(key, 7)
    return {
        'w_qkv':  jax.random.normal(ks[0], (3 * inner, dim), jnp.float32) * (dim ** -0.5),
        'w_cnn1': jax.random.normal(ks[1], (heads, 3), jnp.float32) * 0.5,
        'b_cnn1': jax.random.normal(ks[2], (heads,), jnp.float32) * 0.1,
        'w_cnn2': jax.random.normal(ks[3], (heads, heads), jnp.float32) * 0.5,
        'b_cnn2': jax.random.normal(ks[4], (heads,), jnp.float32) * 0.1,
        'w_out':  jax.random.normal(ks[5], (dim, inner), jnp.float32) * (inner ** -0.5),
        'b_out':  jax.random.normal(ks[6], (dim,), jnp.float32) * 0.1,
    }


if __name__ == "__main__":
    root = jax.random.PRNGKey(0)
    k_small, k_big = jax.random.split(root)

    # -------- Case 1: small, single-tile (module's tiny test shapes) --------
    B, N, DIM, HEADS, DIM_HEAD = 2, 8, 32, 4, 8
    kp, kx, kd = jax.random.split(k_small, 3)
    params = _make_params(kp, DIM, HEADS, DIM_HEAD)
    x = jax.random.normal(kx, (B, N, DIM), jnp.float32)
    dist = jax.random.uniform(kd, (B, N, N), jnp.float32, minval=0.0, maxval=10.0)
    ref = reference_forward(params, x, dist, heads=HEADS, dim_head=DIM_HEAD)

    # Exact path (f32 operands, exact reciprocals): tight check.
    out_exact = attention_structure_forward(
        params, x, dist, heads=HEADS, dim_head=DIM_HEAD,
        compute_dtype=jnp.float32, approx=False)
    out_exact = jax.block_until_ready(out_exact)
    assert out_exact.shape == (B, N, DIM)
    assert jnp.allclose(out_exact, ref, atol=1e-4, rtol=1e-4), \
        "mismatch vs pure-JAX reference (small, exact path)"

    # Production path (bf16 MXU operands, bf16 dist, EUP approx reciprocals).
    out_fast = attention_structure_forward(
        params, x, dist.astype(jnp.bfloat16), heads=HEADS, dim_head=DIM_HEAD,
        compute_dtype=jnp.bfloat16, approx=True)
    out_fast = jax.block_until_ready(out_fast)
    assert jnp.allclose(out_fast, ref, atol=5e-2, rtol=5e-2), \
        "mismatch vs pure-JAX reference (small, fast path)"

    # -------- Case 2: tiled flash path (multi q-tile / k-tile grid) ----------
    B2, N2, DIM2, HEADS2, DIM_HEAD2 = 2, 256, 64, 8, 32
    kp2, kx2, kd2 = jax.random.split(k_big, 3)
    params2 = _make_params(kp2, DIM2, HEADS2, DIM_HEAD2)
    x2 = jax.random.normal(kx2, (B2, N2, DIM2), jnp.float32)
    dist2 = jax.random.uniform(kd2, (B2, N2, N2), jnp.float32, minval=0.0, maxval=10.0)
    ref2 = reference_forward(params2, x2, dist2, heads=HEADS2, dim_head=DIM_HEAD2)

    out2_exact = attention_structure_forward(
        params2, x2, dist2, heads=HEADS2, dim_head=DIM_HEAD2,
        block_q=128, block_k=128, compute_dtype=jnp.float32, approx=False)
    out2_exact = jax.block_until_ready(out2_exact)
    assert out2_exact.shape == (B2, N2, DIM2)
    assert jnp.allclose(out2_exact, ref2, atol=5e-4, rtol=5e-4), \
        "mismatch vs pure-JAX reference (tiled, exact path)"

    out2_fast = attention_structure_forward(
        params2, x2, dist2.astype(jnp.bfloat16), heads=HEADS2, dim_head=DIM_HEAD2,
        block_q=128, block_k=128, compute_dtype=jnp.bfloat16, approx=True)
    out2_fast = jax.block_until_ready(out2_fast)
    assert jnp.allclose(out2_fast, ref2, atol=5e-2, rtol=5e-2), \
        "mismatch vs pure-JAX reference (tiled, fast path)"

    print("KERNEL_OK")
</pallas_src>

<mosaic_0001>
module attributes {stable_mosaic.version = 11 : i64} {
  func.func @_flash_attn_dist_kernel(%arg0: i32, %arg1: i32, %arg2: i32, %arg3: memref<1x8x32xf32, #tpu.memory_space<vmem>>, %arg4: memref<1x8x32xf32, #tpu.memory_space<vmem>>, %arg5: memref<1x8x32xf32, #tpu.memory_space<vmem>>, %arg6: memref<1x8x8xf32, #tpu.memory_space<vmem>>, %arg7: memref<32x32xf32, #tpu.memory_space<vmem>>, %arg8: memref<1x32xf32, #tpu.memory_space<vmem>>, %arg9: memref<4x3xf32, #tpu.memory_space<smem>>, %arg10: memref<4xf32, #tpu.memory_space<smem>>, %arg11: memref<4x4xf32, #tpu.memory_space<smem>>, %arg12: memref<4xf32, #tpu.memory_space<smem>>, %arg13: memref<1x8x32xf32, #tpu.memory_space<vmem>>, %arg14: memref<4x8x1xf32, #tpu.memory_space<vmem>>, %arg15: memref<4x8x1xf32, #tpu.memory_space<vmem>>, %arg16: memref<4x8x8xf32, #tpu.memory_space<vmem>>, %arg17: memref<4x8x8xf32, #tpu.memory_space<vmem>>) attributes {dimension_semantics = [#tpu.dimension_semantics<parallel>, #tpu.dimension_semantics<parallel>, #tpu.dimension_semantics<arbitrary>], iteration_bounds = array<i64: 2, 1, 1>, scalar_prefetch = 0 : i64, scratch_operands = 4 : i64, tpu.core_type = #tpu.core_type<tc>, window_params = [{transform_indices = @transform_0, window_bounds = array<i64: 1, 8, 32>}, {transform_indices = @transform_1, window_bounds = array<i64: 1, 8, 32>}, {transform_indices = @transform_2, window_bounds = array<i64: 1, 8, 32>}, {transform_indices = @transform_3, window_bounds = array<i64: 1, 8, 8>}, {pipeline_mode = #tpu.pipeline_mode<synchronous>, transform_indices = @transform_4, window_bounds = array<i64: 32, 32>}, {pipeline_mode = #tpu.pipeline_mode<synchronous>, transform_indices = @transform_5, window_bounds = array<i64: 1, 32>}, {transform_indices = @transform_6, window_bounds = array<i64: 4, 3>}, {transform_indices = @transform_7, window_bounds = array<i64: 4>}, {transform_indices = @transform_8, window_bounds = array<i64: 4, 4>}, {transform_indices = @transform_9, window_bounds = array<i64: 4>}, {transform_indices = @transform_10, window_bounds = array<i64: 1, 8, 32>}]} {
    %c0_i32 = arith.constant 0 : i32
    %0 = arith.cmpi eq, %arg2, %c0_i32 : i32
    %1 = arith.extui %0 : i1 to i32
    %c0_i32_0 = arith.constant 0 : i32
    %2 = arith.cmpi ne, %1, %c0_i32_0 : i32
    scf.if %2 {
      %cst_230 = arith.constant 0xFF800000 : f32
      %351 = vector.broadcast %cst_230 : f32 to vector<4x8x1xf32>
      %c0_231 = arith.constant 0 : index
      %c0_232 = arith.constant 0 : index
      %c0_233 = arith.constant 0 : index
      %352 = vector.load %arg14[%c0_231, %c0_232, %c0_233] : memref<4x8x1xf32, #tpu.memory_space<vmem>>, vector<4x8x1xf32>
      tpu.vector_store %arg14[%c0_231, %c0_232, %c0_233], %351 {strides = array<i32>} : memref<4x8x1xf32, #tpu.memory_space<vmem>>, vector<4x8x1xf32>,
      %cst_234 = arith.constant 0.000000e+00 : f32
      %353 = vector.broadcast %cst_234 : f32 to vector<4x8x1xf32>
      %c0_235 = arith.constant 0 : index
      %c0_236 = arith.constant 0 : index
      %c0_237 = arith.constant 0 : index
      %354 = vector.load %arg15[%c0_235, %c0_236, %c0_237] : memref<4x8x1xf32, #tpu.memory_space<vmem>>, vector<4x8x1xf32>
      tpu.vector_store %arg15[%c0_235, %c0_236, %c0_237], %353 {strides = array<i32>} : memref<4x8x1xf32, #tpu.memory_space<vmem>>, vector<4x8x1xf32>,
      %cst_238 = arith.constant 0.000000e+00 : f32
      %355 = vector.broadcast %cst_238 : f32 to vector<4x8x8xf32>
      %c0_239 = arith.constant 0 : index
      %c0_240 = arith.constant 0 : index
      %c0_241 = arith.constant 0 : index
      %356 = vector.load %arg16[%c0_239, %c0_240, %c0_241] : memref<4x8x8xf32, #tpu.memory_space<vmem>>, vector<4x8x8xf32>
      tpu.vector_store %arg16[%c0_239, %c0_240, %c0_241], %355 {strides = array<i32>} : memref<4x8x8xf32, #tpu.memory_space<vmem>>, vector<4x8x8xf32>,
    } else {
    }
    %c0 = arith.constant 0 : index
    %c0_1 = arith.constant 0 : index
    %c0_2 = arith.constant 0 : index
    %3 = vector.load %arg6[%c0, %c0_1, %c0_2] : memref<1x8x8xf32, #tpu.memory_space<vmem>>, vector<1x8x8xf32>
    %4 = vector.shape_cast %3 : vector<1x8x8xf32> to vector<8x8xf32>
    %cst = arith.constant 0.263157904 : f32
    %5 = vector.broadcast %cst : f32 to vector<8x8xf32>
    %6 = arith.mulf %4, %5 : vector<8x8xf32>
    %7 = arith.mulf %6, %6 : vector<8x8xf32>
    %8 = arith.mulf %7, %6 : vector<8x8xf32>
    %cst_3 = arith.constant 1.000000e+00 : f32
    %9 = vector.broadcast %cst_3 : f32 to vector<8x8xf32>
    %10 = arith.addf %9, %6 : vector<8x8xf32>
    %11 = tpu.reciprocal %10 : vector<8x8xf32> -> vector<8x8xf32>
    %cst_4 = arith.constant 1.000000e+00 : f32
    %12 = vector.broadcast %cst_4 : f32 to vector<8x8xf32>
    %13 = arith.addf %12, %7 : vector<8x8xf32>
    %14 = tpu.reciprocal %13 : vector<8x8xf32> -> vector<8x8xf32>
    %cst_5 = arith.constant 1.000000e+00 : f32
    %15 = vector.broadcast %cst_5 : f32 to vector<8x8xf32>
    %16 = arith.addf %15, %8 : vector<8x8xf32>
    %17 = tpu.reciprocal %16 : vector<8x8xf32> -> vector<8x8xf32>
    %c0_6 = arith.constant 0 : index
    %c0_7 = arith.constant 0 : index
    %18 = memref.load %arg9[%c0_6, %c0_7] : memref<4x3xf32, #tpu.memory_space<smem>>
    %19 = vector.broadcast %18 : f32 to vector<8x8xf32>
    %20 = arith.mulf %19, %11 : vector<8x8xf32>
    %c0_8 = arith.constant 0 : index
    %c1 = arith.constant 1 : index
    %21 = memref.load %arg9[%c0_8, %c1] : memref<4x3xf32, #tpu.memory_space<smem>>
    %22 = vector.broadcast %21 : f32 to vector<8x8xf32>
    %23 = arith.mulf %22, %14 : vector<8x8xf32>
    %24 = arith.addf %20, %23 : vector<8x8xf32>
    %c0_9 = arith.constant 0 : index
    %c2 = arith.constant 2 : index
    %25 = memref.load %arg9[%c0_9, %c2] : memref<4x3xf32, #tpu.memory_space<smem>>
    %26 = vector.broadcast %25 : f32 to vector<8x8xf32>
    %27 = arith.mulf %26, %17 : vector<8x8xf32>
    %28 = arith.addf %24, %27 : vector<8x8xf32>
    %c0_10 = arith.constant 0 : index
    %29 = memref.load %arg10[%c0_10] : memref<4xf32, #tpu.memory_space<smem>>
    %30 = vector.broadcast %29 : f32 to vector<8x8xf32>
    %31 = arith.addf %28, %30 : vector<8x8xf32>
    %cst_11 = arith.constant 0.000000e+00 : f32
    %32 = vector.broadcast %cst_11 : f32 to vector<8x8xf32>
    %33 = arith.maximumf %31, %32 : vector<8x8xf32>
    %c0_12 = arith.constant 0 : index
    %c0_13 = arith.constant 0 : index
    %c0_14 = arith.constant 0 : index
    %34 = vector.load %arg17[%c0_12, %c0_13, %c0_14] : memref<4x8x8xf32, #tpu.memory_space<vmem>>, vector<1x8x8xf32>
    %35 = vector.shape_cast %34 : vector<1x8x8xf32> to vector<8x8xf32>
    %36 = vector.shape_cast %33 : vector<8x8xf32> to vector<1x8x8xf32>
    tpu.vector_store %arg17[%c0_12, %c0_13, %c0_14], %36 {strides = array<i32>} : memref<4x8x8xf32, #tpu.memory_space<vmem>>, vector<1x8x8xf32>,
    %c1_15 = arith.constant 1 : index
    %c0_16 = arith.constant 0 : index
    %37 = memref.load %arg9[%c1_15, %c0_16] : memref<4x3xf32, #tpu.memory_space<smem>>
    %38 = vector.broadcast %37 : f32 to vector<8x8xf32>
    %39 = arith.mulf %38, %11 : vector<8x8xf32>
    %c1_17 = arith.constant 1 : index
    %c1_18 = arith.constant 1 : index
    %40 = memref.load %arg9[%c1_17, %c1_18] : memref<4x3xf32, #tpu.memory_space<smem>>
    %41 = vector.broadcast %40 : f32 to vector<8x8xf32>
    %42 = arith.mulf %41, %14 : vector<8x8xf32>
    %43 = arith.addf %39, %42 : vector<8x8xf32>
    %c1_19 = arith.constant 1 : index
    %c2_20 = arith.constant 2 : index
    %44 = memref.load %arg9[%c1_19, %c2_20] : memref<4x3xf32, #tpu.memory_space<smem>>
    %45 = vector.broadcast %44 : f32 to vector<8x8xf32>
    %46 = arith.mulf %45, %17 : vector<8x8xf32>
    %47 = arith.addf %43, %46 : vector<8x8xf32>
    %c1_21 = arith.constant 1 : index
    %48 = memref.load %arg10[%c1_21] : memref<4xf32, #tpu.memory_space<smem>>
    %49 = vector.broadcast %48 : f32 to vector<8x8xf32>
    %50 = arith.addf %47, %49 : vector<8x8xf32>
    %cst_22 = arith.constant 0.000000e+00 : f32
    %51 = vector.broadcast %cst_22 : f32 to vector<8x8xf32>
    %52 = arith.maximumf %50, %51 : vector<8x8xf32>
    %c1_23 = arith.constant 1 : index
    %c0_24 = arith.constant 0 : index
    %c0_25 = arith.constant 0 : index
    %53 = vector.load %arg17[%c1_23, %c0_24, %c0_25] : memref<4x8x8xf32, #tpu.memory_space<vmem>>, vector<1x8x8xf32>
    %54 = vector.shape_cast %53 : vector<1x8x8xf32> to vector<8x8xf32>
    %55 = vector.shape_cast %52 : vector<8x8xf32> to vector<1x8x8xf32>
    tpu.vector_store %arg17[%c1_23, %c0_24, %c0_25], %55 {strides = array<i32>} : memref<4x8x8xf32, #tpu.memory_space<vmem>>, vector<1x8x8xf32>,
    %c2_26 = arith.constant 2 : index
    %c0_27 = arith.constant 0 : index
    %56 = memref.load %arg9[%c2_26, %c0_27] : memref<4x3xf32, #tpu.memory_space<smem>>
    %57 = vector.broadcast %56 : f32 to vector<8x8xf32>
    %58 = arith.mulf %57, %11 : vector<8x8xf32>
    %c2_28 = arith.constant 2 : index
    %c1_29 = arith.constant 1 : index
    %59 = memref.load %arg9[%c2_28, %c1_29] : memref<4x3xf32, #tpu.memory_space<smem>>
    %60 = vector.broadcast %59 : f32 to vector<8x8xf32>
    %61 = arith.mulf %60, %14 : vector<8x8xf32>
    %62 = arith.addf %58, %61 : vector<8x8xf32>
    %c2_30 = arith.constant 2 : index
    %c2_31 = arith.constant 2 : index
    %63 = memref.load %arg9[%c2_30, %c2_31] : memref<4x3xf32, #tpu.memory_space<smem>>
    %64 = vector.broadcast %63 : f32 to vector<8x8xf32>
    %65 = arith.mulf %64, %17 : vector<8x8xf32>
    %66 = arith.addf %62, %65 : vector<8x8xf32>
    %c2_32 = arith.constant 2 : index
    %67 = memref.load %arg10[%c2_32] : memref<4xf32, #tpu.memory_space<smem>>
    %68 = vector.broadcast %67 : f32 to vector<8x8xf32>
    %69 = arith.addf %66, %68 : vector<8x8xf32>
    %cst_33 = arith.constant 0.000000e+00 : f32
    %70 = vector.broadcast %cst_33 : f32 to vector<8x8xf32>
    %71 = arith.maximumf %69, %70 : vector<8x8xf32>
    %c2_34 = arith.constant 2 : index
    %c0_35 = arith.constant 0 : index
    %c0_36 = arith.constant 0 : index
    %72 = vector.load %arg17[%c2_34, %c0_35, %c0_36] : memref<4x8x8xf32, #tpu.memory_space<vmem>>, vector<1x8x8xf32>
    %73 = vector.shape_cast %72 : vector<1x8x8xf32> to vector<8x8xf32>
    %74 = vector.shape_cast %71 : vector<8x8xf32> to vector<1x8x8xf32>
    tpu.vector_store %arg17[%c2_34, %c0_35, %c0_36], %74 {strides = array<i32>} : memref<4x8x8xf32, #tpu.memory_space<vmem>>, vector<1x8x8xf32>,
    %c3 = arith.constant 3 : index
    %c0_37 = arith.constant 0 : index
    %75 = memref.load %arg9[%c3, %c0_37] : memref<4x3xf32, #tpu.memory_space<smem>>
    %76 = vector.broadcast %75 : f32 to vector<8x8xf32>
    %77 = arith.mulf %76, %11 : vector<8x8xf32>
    %c3_38 = arith.constant 3 : index
    %c1_39 = arith.constant 1 : index
    %78 = memref.load %arg9[%c3_38, %c1_39] : memref<4x3xf32, #tpu.memory_space<smem>>
    %79 = vector.broadcast %78 : f32 to vector<8x8xf32>
    %80 = arith.mulf %79, %14 : vector<8x8xf32>
    %81 = arith.addf %77, %80 : vector<8x8xf32>
    %c3_40 = arith.constant 3 : index
    %c2_41 = arith.constant 2 : index
    %82 = memref.load %arg9[%c3_40, %c2_41] : memref<4x3xf32, #tpu.memory_space<smem>>
    %83 = vector.broadcast %82 : f32 to vector<8x8xf32>
    %84 = arith.mulf %83, %17 : vector<8x8xf32>
    %85 = arith.addf %81, %84 : vector<8x8xf32>
    %c3_42 = arith.constant 3 : index
    %86 = memref.load %arg10[%c3_42] : memref<4xf32, #tpu.memory_space<smem>>
    %87 = vector.broadcast %86 : f32 to vector<8x8xf32>
    %88 = arith.addf %85, %87 : vector<8x8xf32>
    %cst_43 = arith.constant 0.000000e+00 : f32
    %89 = vector.broadcast %cst_43 : f32 to vector<8x8xf32>
    %90 = arith.maximumf %88, %89 : vector<8x8xf32>
    %c3_44 = arith.constant 3 : index
    %c0_45 = arith.constant 0 : index
    %c0_46 = arith.constant 0 : index
    %91 = vector.load %arg17[%c3_44, %c0_45, %c0_46] : memref<4x8x8xf32, #tpu.memory_space<vmem>>, vector<1x8x8xf32>
    %92 = vector.shape_cast %91 : vector<1x8x8xf32> to vector<8x8xf32>
    %93 = vector.shape_cast %90 : vector<8x8xf32> to vector<1x8x8xf32>
    tpu.vector_store %arg17[%c3_44, %c0_45, %c0_46], %93 {strides = array<i32>} : memref<4x8x8xf32, #tpu.memory_space<vmem>>, vector<1x8x8xf32>,
    %c0_47 = arith.constant 0 : index
    %c0_48 = arith.constant 0 : index
    %c0_49 = arith.constant 0 : index
    %94 = vector.load %arg3[%c0_47, %c0_48, %c0_49] : memref<1x8x32xf32, #tpu.memory_space<vmem>>, vector<1x8x32xf32>
    %95 = vector.shape_cast %94 : vector<1x8x32xf32> to vector<8x32xf32>
    %c0_50 = arith.constant 0 : index
    %c0_51 = arith.constant 0 : index
    %c0_52 = arith.constant 0 : index
    %96 = vector.load %arg4[%c0_50, %c0_51, %c0_52] : memref<1x8x32xf32, #tpu.memory_space<vmem>>, vector<1x8x32xf32>
    %97 = vector.shape_cast %96 : vector<1x8x32xf32> to vector<8x32xf32>
    %c0_53 = arith.constant 0 : index
    %c0_54 = arith.constant 0 : index
    %c0_55 = arith.constant 0 : index
    %98 = vector.load %arg5[%c0_53, %c0_54, %c0_55] : memref<1x8x32xf32, #tpu.memory_space<vmem>>, vector<1x8x32xf32>
    %99 = vector.shape_cast %98 : vector<1x8x32xf32> to vector<8x32xf32>
    %c0_56 = arith.constant 0 : index
    %c0_57 = arith.constant 0 : index
    %100 = memref.load %arg11[%c0_56, %c0_57] : memref<4x4xf32, #tpu.memory_space<smem>>
    %c0_58 = arith.constant 0 : index
    %c0_59 = arith.constant 0 : index
    %c0_60 = arith.constant 0 : index
    %101 = vector.load %arg17[%c0_58, %c0_59, %c0_60] : memref<4x8x8xf32, #tpu.memory_space<vmem>>, vector<1x8x8xf32>
    %102 = vector.shape_cast %101 : vector<1x8x8xf32> to vector<8x8xf32>
    %103 = vector.broadcast %100 : f32 to vector<8x8xf32>
    %104 = arith.mulf %103, %102 : vector<8x8xf32>
    %c0_61 = arith.constant 0 : index
    %105 = memref.load %arg12[%c0_61] : memref<4xf32, #tpu.memory_space<smem>>
    %106 = vector.broadcast %105 : f32 to vector<8x8xf32>
    %107 = arith.addf %104, %106 : vector<8x8xf32>
    %c0_62 = arith.constant 0 : index
    %c1_63 = arith.constant 1 : index
    %108 = memref.load %arg11[%c0_62, %c1_63] : memref<4x4xf32, #tpu.memory_space<smem>>
    %c1_64 = arith.constant 1 : index
    %c0_65 = arith.constant 0 : index
    %c0_66 = arith.constant 0 : index
    %109 = vector.load %arg17[%c1_64, %c0_65, %c0_66] : memref<4x8x8xf32, #tpu.memory_space<vmem>>, vector<1x8x8xf32>
    %110 = vector.shape_cast %109 : vector<1x8x8xf32> to vector<8x8xf32>
    %111 = vector.broadcast %108 : f32 to vector<8x8xf32>
    %112 = arith.mulf %111, %110 : vector<8x8xf32>
    %113 = arith.addf %107, %112 : vector<8x8xf32>
    %c0_67 = arith.constant 0 : index
    %c2_68 = arith.constant 2 : index
    %114 = memref.load %arg11[%c0_67, %c2_68] : memref<4x4xf32, #tpu.memory_space<smem>>
    %c2_69 = arith.constant 2 : index
    %c0_70 = arith.constant 0 : index
    %c0_71 = arith.constant 0 : index
    %115 = vector.load %arg17[%c2_69, %c0_70, %c0_71] : memref<4x8x8xf32, #tpu.memory_space<vmem>>, vector<1x8x8xf32>
    %116 = vector.shape_cast %115 : vector<1x8x8xf32> to vector<8x8xf32>
    %117 = vector.broadcast %114 : f32 to vector<8x8xf32>
    %118 = arith.mulf %117, %116 : vector<8x8xf32>
    %119 = arith.addf %113, %118 : vector<8x8xf32>
    %c0_72 = arith.constant 0 : index
    %c3_73 = arith.constant 3 : index
    %120 = memref.load %arg11[%c0_72, %c3_73] : memref<4x4xf32, #tpu.memory_space<smem>>
    %c3_74 = arith.constant 3 : index
    %c0_75 = arith.constant 0 : index
    %c0_76 = arith.constant 0 : index
    %121 = vector.load %arg17[%c3_74, %c0_75, %c0_76] : memref<4x8x8xf32, #tpu.memory_space<vmem>>, vector<1x8x8xf32>
    %122 = vector.shape_cast %121 : vector<1x8x8xf32> to vector<8x8xf32>
    %123 = vector.broadcast %120 : f32 to vector<8x8xf32>
    %124 = arith.mulf %123, %122 : vector<8x8xf32>
    %125 = arith.addf %119, %124 : vector<8x8xf32>
    %126 = vector.extract_strided_slice %95 {offsets = [0, 0], sizes = [8, 8], strides = [1, 1]} : vector<8x32xf32> to vector<8x8xf32>
    %127 = vector.extract_strided_slice %97 {offsets = [0, 0], sizes = [8, 8], strides = [1, 1]} : vector<8x32xf32> to vector<8x8xf32>
    %128 = vector.extract_strided_slice %99 {offsets = [0, 0], sizes = [8, 8], strides = [1, 1]} : vector<8x32xf32> to vector<8x8xf32>
    %cst_77 = arith.constant dense<0.000000e+00> : vector<8x8xf32>
    %129 = tpu.matmul %126, %127, %cst_77 {dimension_numbers = #tpu.dot_dimension_numbers<[1], [1], [0], [0], [0, 0, 1, 0], [], []>} : vector<8x8xf32>, vector<8x8xf32>, vector<8x8xf32> -> vector<8x8xf32>
    %130 = arith.addf %129, %125 : vector<8x8xf32>
    %c0_78 = arith.constant 0 : index
    %c0_79 = arith.constant 0 : index
    %c0_80 = arith.constant 0 : index
    %131 = vector.load %arg14[%c0_78, %c0_79, %c0_80] : memref<4x8x1xf32, #tpu.memory_space<vmem>>, vector<1x8x1xf32>
    %132 = vector.shape_cast %131 : vector<1x8x1xf32> to vector<8x1xf32>
    %c0_81 = arith.constant 0 : index
    %c0_82 = arith.constant 0 : index
    %c0_83 = arith.constant 0 : index
    %133 = vector.load %arg15[%c0_81, %c0_82, %c0_83] : memref<4x8x1xf32, #tpu.memory_space<vmem>>, vector<1x8x1xf32>
    %134 = vector.shape_cast %133 : vector<1x8x1xf32> to vector<8x1xf32>
    %cst_84 = arith.constant dense<0xFF800000> : vector<8xf32>
    %135 = vector.multi_reduction <maximumf>, %130, %cst_84 [1] : vector<8x8xf32> to vector<8xf32>
    %136 = vector.shape_cast %135 : vector<8xf32> to vector<8x1xf32>
    %137 = arith.maximumf %132, %136 : vector<8x1xf32>
    %138 = arith.subf %132, %137 : vector<8x1xf32>
    %139 = math.exp %138 : vector<8x1xf32>
    %140 = vector.broadcast %137 : vector<8x1xf32> to vector<8x8xf32>
    %141 = arith.subf %130, %140 : vector<8x8xf32>
    %142 = math.exp %141 : vector<8x8xf32>
    %143 = arith.mulf %139, %134 : vector<8x1xf32>
    %cst_85 = arith.constant dense<0.000000e+00> : vector<8xf32>
    %144 = vector.multi_reduction <add>, %142, %cst_85 [1] : vector<8x8xf32> to vector<8xf32>
    %145 = vector.shape_cast %144 : vector<8xf32> to vector<8x1xf32>
    %146 = arith.addf %143, %145 : vector<8x1xf32>
    %c0_86 = arith.constant 0 : index
    %c0_87 = arith.constant 0 : index
    %c0_88 = arith.constant 0 : index
    %147 = vector.load %arg15[%c0_86, %c0_87, %c0_88] : memref<4x8x1xf32, #tpu.memory_space<vmem>>, vector<1x8x1xf32>
    %148 = vector.shape_cast %147 : vector<1x8x1xf32> to vector<8x1xf32>
    %149 = vector.shape_cast %146 : vector<8x1xf32> to vector<1x8x1xf32>
    tpu.vector_store %arg15[%c0_86, %c0_87, %c0_88], %149 {strides = array<i32>} : memref<4x8x1xf32, #tpu.memory_space<vmem>>, vector<1x8x1xf32>,
    %c0_89 = arith.constant 0 : index
    %c0_90 = arith.constant 0 : index
    %c0_91 = arith.constant 0 : index
    %150 = vector.load %arg16[%c0_89, %c0_90, %c0_91] : memref<4x8x8xf32, #tpu.memory_space<vmem>>, vector<1x8x8xf32>
    %151 = vector.shape_cast %150 : vector<1x8x8xf32> to vector<8x8xf32>
    %152 = vector.broadcast %139 : vector<8x1xf32> to vector<8x8xf32>
    %153 = arith.mulf %152, %151 : vector<8x8xf32>
    %cst_92 = arith.constant dense<0.000000e+00> : vector<8x8xf32>
    %154 = tpu.matmul %142, %128, %cst_92 {dimension_numbers = #tpu.dot_dimension_numbers<[1], [0], [0], [1], [0, 0, 1, 1], [], []>} : vector<8x8xf32>, vector<8x8xf32>, vector<8x8xf32> -> vector<8x8xf32>
    %155 = arith.addf %153, %154 : vector<8x8xf32>
    %c0_93 = arith.constant 0 : index
    %c0_94 = arith.constant 0 : index
    %c0_95 = arith.constant 0 : index
    %156 = vector.load %arg16[%c0_93, %c0_94, %c0_95] : memref<4x8x8xf32, #tpu.memory_space<vmem>>, vector<1x8x8xf32>
    %157 = vector.shape_cast %156 : vector<1x8x8xf32> to vector<8x8xf32>
    %158 = vector.shape_cast %155 : vector<8x8xf32> to vector<1x8x8xf32>
    tpu.vector_store %arg16[%c0_93, %c0_94, %c0_95], %158 {strides = array<i32>} : memref<4x8x8xf32, #tpu.memory_space<vmem>>, vector<1x8x8xf32>,
    %c0_96 = arith.constant 0 : index
    %c0_97 = arith.constant 0 : index
    %c0_98 = arith.constant 0 : index
    %159 = vector.load %arg14[%c0_96, %c0_97, %c0_98] : memref<4x8x1xf32, #tpu.memory_space<vmem>>, vector<1x8x1xf32>
    %160 = vector.shape_cast %159 : vector<1x8x1xf32> to vector<8x1xf32>
    %161 = vector.shape_cast %137 : vector<8x1xf32> to vector<1x8x1xf32>
    tpu.vector_store %arg14[%c0_96, %c0_97, %c0_98], %161 {strides = array<i32>} : memref<4x8x1xf32, #tpu.memory_space<vmem>>, vector<1x8x1xf32>,
    %c1_99 = arith.constant 1 : index
    %c0_100 = arith.constant 0 : index
    %162 = memref.load %arg11[%c1_99, %c0_100] : memref<4x4xf32, #tpu.memory_space<smem>>
    %c0_101 = arith.constant 0 : index
    %c0_102 = arith.constant 0 : index
    %c0_103 = arith.constant 0 : index
    %163 = vector.load %arg17[%c0_101, %c0_102, %c0_103] : memref<4x8x8xf32, #tpu.memory_space<vmem>>, vector<1x8x8xf32>
    %164 = vector.shape_cast %163 : vector<1x8x8xf32> to vector<8x8xf32>
    %165 = vector.broadcast %162 : f32 to vector<8x8xf32>
    %166 = arith.mulf %165, %164 : vector<8x8xf32>
    %c1_104 = arith.constant 1 : index
    %167 = memref.load %arg12[%c1_104] : memref<4xf32, #tpu.memory_space<smem>>
    %168 = vector.broadcast %167 : f32 to vector<8x8xf32>
    %169 = arith.addf %166, %168 : vector<8x8xf32>
    %c1_105 = arith.constant 1 : index
    %c1_106 = arith.constant 1 : index
    %170 = memref.load %arg11[%c1_105, %c1_106] : memref<4x4xf32, #tpu.memory_space<smem>>
    %c1_107 = arith.constant 1 : index
    %c0_108 = arith.constant 0 : index
    %c0_109 = arith.constant 0 : index
    %171 = vector.load %arg17[%c1_107, %c0_108, %c0_109] : memref<4x8x8xf32, #tpu.memory_space<vmem>>, vector<1x8x8xf32>
    %172 = vector.shape_cast %171 : vector<1x8x8xf32> to vector<8x8xf32>
    %173 = vector.broadcast %170 : f32 to vector<8x8xf32>
    %174 = arith.mulf %173, %172 : vector<8x8xf32>
    %175 = arith.addf %169, %174 : vector<8x8xf32>
    %c1_110 = arith.constant 1 : index
    %c2_111 = arith.constant 2 : index
    %176 = memref.load %arg11[%c1_110, %c2_111] : memref<4x4xf32, #tpu.memory_space<smem>>
    %c2_112 = arith.constant 2 : index
    %c0_113 = arith.constant 0 : index
    %c0_114 = arith.constant 0 : index
    %177 = vector.load %arg17[%c2_112, %c0_113, %c0_114] : memref<4x8x8xf32, #tpu.memory_space<vmem>>, vector<1x8x8xf32>
    %178 = vector.shape_cast %177 : vector<1x8x8xf32> to vector<8x8xf32>
    %179 = vector.broadcast %176 : f32 to vector<8x8xf32>
    %180 = arith.mulf %179, %178 : vector<8x8xf32>
    %181 = arith.addf %175, %180 : vector<8x8xf32>
    %c1_115 = arith.constant 1 : index
    %c3_116 = arith.constant 3 : index
    %182 = memref.load %arg11[%c1_115, %c3_116] : memref<4x4xf32, #tpu.memory_space<smem>>
    %c3_117 = arith.constant 3 : index
    %c0_118 = arith.constant 0 : index
    %c0_119 = arith.constant 0 : index
    %183 = vector.load %arg17[%c3_117, %c0_118, %c0_119] : memref<4x8x8xf32, #tpu.memory_space<vmem>>, vector<1x8x8xf32>
    %184 = vector.shape_cast %183 : vector<1x8x8xf32> to vector<8x8xf32>
    %185 = vector.broadcast %182 : f32 to vector<8x8xf32>
    %186 = arith.mulf %185, %184 : vector<8x8xf32>
    %187 = arith.addf %181, %186 : vector<8x8xf32>
    %188 = vector.extract_strided_slice %95 {offsets = [0, 8], sizes = [8, 8], strides = [1, 1]} : vector<8x32xf32> to vector<8x8xf32>
    %189 = vector.extract_strided_slice %97 {offsets = [0, 8], sizes = [8, 8], strides = [1, 1]} : vector<8x32xf32> to vector<8x8xf32>
    %190 = vector.extract_strided_slice %99 {offsets = [0, 8], sizes = [8, 8], strides = [1, 1]} : vector<8x32xf32> to vector<8x8xf32>
    %cst_120 = arith.constant dense<0.000000e+00> : vector<8x8xf32>
    %191 = tpu.matmul %188, %189, %cst_120 {dimension_numbers = #tpu.dot_dimension_numbers<[1], [1], [0], [0], [0, 0, 1, 0], [], []>} : vector<8x8xf32>, vector<8x8xf32>, vector<8x8xf32> -> vector<8x8xf32>
    %192 = arith.addf %191, %187 : vector<8x8xf32>
    %c1_121 = arith.constant 1 : index
    %c0_122 = arith.constant 0 : index
    %c0_123 = arith.constant 0 : index
    %193 = vector.load %arg14[%c1_121, %c0_122, %c0_123] : memref<4x8x1xf32, #tpu.memory_space<vmem>>, vector<1x8x1xf32>
    %194 = vector.shape_cast %193 : vector<1x8x1xf32> to vector<8x1xf32>
    %c1_124 = arith.constant 1 : index
    %c0_125 = arith.constant 0 : index
    %c0_126 = arith.constant 0 : index
    %195 = vector.load %arg15[%c1_124, %c0_125, %c0_126] : memref<4x8x1xf32, #tpu.memory_space<vmem>>, vector<1x8x1xf32>
    %196 = vector.shape_cast %195 : vector<1x8x1xf32> to vector<8x1xf32>
    %cst_127 = arith.constant dense<0xFF800000> : vector<8xf32>
    %197 = vector.multi_reduction <maximumf>, %192, %cst_127 [1] : vector<8x8xf32> to vector<8xf32>
    %198 = vector.shape_cast %197 : vector<8xf32> to vector<8x1xf32>
    %199 = arith.maximumf %194, %198 : vector<8x1xf32>
    %200 = arith.subf %194, %199 : vector<8x1xf32>
    %201 = math.exp %200 : vector<8x1xf32>
    %202 = vector.broadcast %199 : vector<8x1xf32> to vector<8x8xf32>
    %203 = arith.subf %192, %202 : vector<8x8xf32>
    %204 = math.exp %203 : vector<8x8xf32>
    %205 = arith.mulf %201, %196 : vector<8x1xf32>
    %cst_128 = arith.constant dense<0.000000e+00> : vector<8xf32>
    %206 = vector.multi_reduction <add>, %204, %cst_128 [1] : vector<8x8xf32> to vector<8xf32>
    %207 = vector.shape_cast %206 : vector<8xf32> to vector<8x1xf32>
    %208 = arith.addf %205, %207 : vector<8x1xf32>
    %c1_129 = arith.constant 1 : index
    %c0_130 = arith.constant 0 : index
    %c0_131 = arith.constant 0 : index
    %209 = vector.load %arg15[%c1_129, %c0_130, %c0_131] : memref<4x8x1xf32, #tpu.memory_space<vmem>>, vector<1x8x1xf32>
    %210 = vector.shape_cast %209 : vector<1x8x1xf32> to vector<8x1xf32>
    %211 = vector.shape_cast %208 : vector<8x1xf32> to vector<1x8x1xf32>
    tpu.vector_store %arg15[%c1_129, %c0_130, %c0_131], %211 {strides = array<i32>} : memref<4x8x1xf32, #tpu.memory_space<vmem>>, vector<1x8x1xf32>,
    %c1_132 = arith.constant 1 : index
    %c0_133 = arith.constant 0 : index
    %c0_134 = arith.constant 0 : index
    %212 = vector.load %arg16[%c1_132, %c0_133, %c0_134] : memref<4x8x8xf32, #tpu.memory_space<vmem>>, vector<1x8x8xf32>
    %213 = vector.shape_cast %212 : vector<1x8x8xf32> to vector<8x8xf32>
    %214 = vector.broadcast %201 : vector<8x1xf32> to vector<8x8xf32>
    %215 = arith.mulf %214, %213 : vector<8x8xf32>
    %cst_135 = arith.constant dense<0.000000e+00> : vector<8x8xf32>
    %216 = tpu.matmul %204, %190, %cst_135 {dimension_numbers = #tpu.dot_dimension_numbers<[1], [0], [0], [1], [0, 0, 1, 1], [], []>} : vector<8x8xf32>, vector<8x8xf32>, vector<8x8xf32> -> vector<8x8xf32>
    %217 = arith.addf %215, %216 : vector<8x8xf32>
    %c1_136 = arith.constant 1 : index
    %c0_137 = arith.constant 0 : index
    %c0_138 = arith.constant 0 : index
    %218 = vector.load %arg16[%c1_136, %c0_137, %c0_138] : memref<4x8x8xf32, #tpu.memory_space<vmem>>, vector<1x8x8xf32>
    %219 = vector.shape_cast %218 : vector<1x8x8xf32> to vector<8x8xf32>
    %220 = vector.shape_cast %217 : vector<8x8xf32> to vector<1x8x8xf32>
    tpu.vector_store %arg16[%c1_136, %c0_137, %c0_138], %220 {strides = array<i32>} : memref<4x8x8xf32, #tpu.memory_space<vmem>>, vector<1x8x8xf32>,
    %c1_139 = arith.constant 1 : index
    %c0_140 = arith.constant 0 : index
    %c0_141 = arith.constant 0 : index
    %221 = vector.load %arg14[%c1_139, %c0_140, %c0_141] : memref<4x8x1xf32, #tpu.memory_space<vmem>>, vector<1x8x1xf32>
    %222 = vector.shape_cast %221 : vector<1x8x1xf32> to vector<8x1xf32>
    %223 = vector.shape_cast %199 : vector<8x1xf32> to vector<1x8x1xf32>
    tpu.vector_store %arg14[%c1_139, %c0_140, %c0_141], %223 {strides = array<i32>} : memref<4x8x1xf32, #tpu.memory_space<vmem>>, vector<1x8x1xf32>,
    %c2_142 = arith.constant 2 : index
    %c0_143 = arith.constant 0 : index
    %224 = memref.load %arg11[%c2_142, %c0_143] : memref<4x4xf32, #tpu.memory_space<smem>>
    %c0_144 = arith.constant 0 : index
    %c0_145 = arith.constant 0 : index
    %c0_146 = arith.constant 0 : index
    %225 = vector.load %arg17[%c0_144, %c0_145, %c0_146] : memref<4x8x8xf32, #tpu.memory_space<vmem>>, vector<1x8x8xf32>
    %226 = vector.shape_cast %225 : vector<1x8x8xf32> to vector<8x8xf32>
    %227 = vector.broadcast %224 : f32 to vector<8x8xf32>
    %228 = arith.mulf %227, %226 : vector<8x8xf32>
    %c2_147 = arith.constant 2 : index
    %229 = memref.load %arg12[%c2_147] : memref<4xf32, #tpu.memory_space<smem>>
    %230 = vector.broadcast %229 : f32 to vector<8x8xf32>
    %231 = arith.addf %228, %230 : vector<8x8xf32>
    %c2_148 = arith.constant 2 : index
    %c1_149 = arith.constant 1 : index
    %232 = memref.load %arg11[%c2_148, %c1_149] : memref<4x4xf32, #tpu.memory_space<smem>>
    %c1_150 = arith.constant 1 : index
    %c0_151 = arith.constant 0 : index
    %c0_152 = arith.constant 0 : index
    %233 = vector.load %arg17[%c1_150, %c0_151, %c0_152] : memref<4x8x8xf32, #tpu.memory_space<vmem>>, vector<1x8x8xf32>
    %234 = vector.shape_cast %233 : vector<1x8x8xf32> to vector<8x8xf32>
    %235 = vector.broadcast %232 : f32 to vector<8x8xf32>
    %236 = arith.mulf %235, %234 : vector<8x8xf32>
    %237 = arith.addf %231, %236 : vector<8x8xf32>
    %c2_153 = arith.constant 2 : index
    %c2_154 = arith.constant 2 : index
    %238 = memref.load %arg11[%c2_153, %c2_154] : memref<4x4xf32, #tpu.memory_space<smem>>
    %c2_155 = arith.constant 2 : index
    %c0_156 = arith.constant 0 : index
    %c0_157 = arith.constant 0 : index
    %239 = vector.load %arg17[%c2_155, %c0_156, %c0_157] : memref<4x8x8xf32, #tpu.memory_space<vmem>>, vector<1x8x8xf32>
    %240 = vector.shape_cast %239 : vector<1x8x8xf32> to vector<8x8xf32>
    %241 = vector.broadcast %238 : f32 to vector<8x8xf32>
    %242 = arith.mulf %241, %240 : vector<8x8xf32>
    %243 = arith.addf %237, %242 : vector<8x8xf32>
    %c2_158 = arith.constant 2 : index
    %c3_159 = arith.constant 3 : index
    %244 = memref.load %arg11[%c2_158, %c3_159] : memref<4x4xf32, #tpu.memory_space<smem>>
    %c3_160 = arith.constant 3 : index
    %c0_161 = arith.constant 0 : index
    %c0_162 = arith.constant 0 : index
    %245 = vector.load %arg17[%c3_160, %c0_161, %c0_162] : memref<4x8x8xf32, #tpu.memory_space<vmem>>, vector<1x8x8xf32>
    %246 = vector.shape_cast %245 : vector<1x8x8xf32> to vector<8x8xf32>
    %247 = vector.broadcast %244 : f32 to vector<8x8xf32>
    %248 = arith.mulf %247, %246 : vector<8x8xf32>
    %249 = arith.addf %243, %248 : vector<8x8xf32>
    %250 = vector.extract_strided_slice %95 {offsets = [0, 16], sizes = [8, 8], strides = [1, 1]} : vector<8x32xf32> to vector<8x8xf32>
    %251 = vector.extract_strided_slice %97 {offsets = [0, 16], sizes = [8, 8], strides = [1, 1]} : vector<8x32xf32> to vector<8x8xf32>
    %252 = vector.extract_strided_slice %99 {offsets = [0, 16], sizes = [8, 8], strides = [1, 1]} : vector<8x32xf32> to vector<8x8xf32>
    %cst_163 = arith.constant dense<0.000000e+00> : vector<8x8xf32>
    %253 = tpu.matmul %250, %251, %cst_163 {dimension_numbers = #tpu.dot_dimension_numbers<[1], [1], [0], [0], [0, 0, 1, 0], [], []>} : vector<8x8xf32>, vector<8x8xf32>, vector<8x8xf32> -> vector<8x8xf32>
    %254 = arith.addf %253, %249 : vector<8x8xf32>
    %c2_164 = arith.constant 2 : index
    %c0_165 = arith.constant 0 : index
    %c0_166 = arith.constant 0 : index
    %255 = vector.load %arg14[%c2_164, %c0_165, %c0_166] : memref<4x8x1xf32, #tpu.memory_space<vmem>>, vector<1x8x1xf32>
    %256 = vector.shape_cast %255 : vector<1x8x1xf32> to vector<8x1xf32>
    %c2_167 = arith.constant 2 : index
    %c0_168 = arith.constant 0 : index
    %c0_169 = arith.constant 0 : index
    %257 = vector.load %arg15[%c2_167, %c0_168, %c0_169] : memref<4x8x1xf32, #tpu.memory_space<vmem>>, vector<1x8x1xf32>
    %258 = vector.shape_cast %257 : vector<1x8x1xf32> to vector<8x1xf32>
    %cst_170 = arith.constant dense<0xFF800000> : vector<8xf32>
    %259 = vector.multi_reduction <maximumf>, %254, %cst_170 [1] : vector<8x8xf32> to vector<8xf32>
    %260 = vector.shape_cast %259 : vector<8xf32> to vector<8x1xf32>
    %261 = arith.maximumf %256, %260 : vector<8x1xf32>
    %262 = arith.subf %256, %261 : vector<8x1xf32>
    %263 = math.exp %262 : vector<8x1xf32>
    %264 = vector.broadcast %261 : vector<8x1xf32> to vector<8x8xf32>
    %265 = arith.subf %254, %264 : vector<8x8xf32>
    %266 = math.exp %265 : vector<8x8xf32>
    %267 = arith.mulf %263, %258 : vector<8x1xf32>
    %cst_171 = arith.constant dense<0.000000e+00> : vector<8xf32>
    %268 = vector.multi_reduction <add>, %266, %cst_171 [1] : vector<8x8xf32> to vector<8xf32>
    %269 = vector.shape_cast %268 : vector<8xf32> to vector<8x1xf32>
    %270 = arith.addf %267, %269 : vector<8x1xf32>
    %c2_172 = arith.constant 2 : index
    %c0_173 = arith.constant 0 : index
    %c0_174 = arith.constant 0 : index
    %271 = vector.load %arg15[%c2_172, %c0_173, %c0_174] : memref<4x8x1xf32, #tpu.memory_space<vmem>>, vector<1x8x1xf32>
    %272 = vector.shape_cast %271 : vector<1x8x1xf32> to vector<8x1xf32>
    %273 = vector.shape_cast %270 : vector<8x1xf32> to vector<1x8x1xf32>
    tpu.vector_store %arg15[%c2_172, %c0_173, %c0_174], %273 {strides = array<i32>} : memref<4x8x1xf32, #tpu.memory_space<vmem>>, vector<1x8x1xf32>,
    %c2_175 = arith.constant 2 : index
    %c0_176 = arith.constant 0 : index
    %c0_177 = arith.constant 0 : index
    %274 = vector.load %arg16[%c2_175, %c0_176, %c0_177] : memref<4x8x8xf32, #tpu.memory_space<vmem>>, vector<1x8x8xf32>
    %275 = vector.shape_cast %274 : vector<1x8x8xf32> to vector<8x8xf32>
    %276 = vector.broadcast %263 : vector<8x1xf32> to vector<8x8xf32>
    %277 = arith.mulf %276, %275 : vector<8x8xf32>
    %cst_178 = arith.constant dense<0.000000e+00> : vector<8x8xf32>
    %278 = tpu.matmul %266, %252, %cst_178 {dimension_numbers = #tpu.dot_dimension_numbers<[1], [0], [0], [1], [0, 0, 1, 1], [], []>} : vector<8x8xf32>, vector<8x8xf32>, vector<8x8xf32> -> vector<8x8xf32>
    %279 = arith.addf %277, %278 : vector<8x8xf32>
    %c2_179 = arith.constant 2 : index
    %c0_180 = arith.constant 0 : index
    %c0_181 = arith.constant 0 : index
    %280 = vector.load %arg16[%c2_179, %c0_180, %c0_181] : memref<4x8x8xf32, #tpu.memory_space<vmem>>, vector<1x8x8xf32>
    %281 = vector.shape_cast %280 : vector<1x8x8xf32> to vector<8x8xf32>
    %282 = vector.shape_cast %279 : vector<8x8xf32> to vector<1x8x8xf32>
    tpu.vector_store %arg16[%c2_179, %c0_180, %c0_181], %282 {strides = array<i32>} : memref<4x8x8xf32, #tpu.memory_space<vmem>>, vector<1x8x8xf32>,
    %c2_182 = arith.constant 2 : index
    %c0_183 = arith.constant 0 : index
    %c0_184 = arith.constant 0 : index
    %283 = vector.load %arg14[%c2_182, %c0_183, %c0_184] : memref<4x8x1xf32, #tpu.memory_space<vmem>>, vector<1x8x1xf32>
    %284 = vector.shape_cast %283 : vector<1x8x1xf32> to vector<8x1xf32>
    %285 = vector.shape_cast %261 : vector<8x1xf32> to vector<1x8x1xf32>
    tpu.vector_store %arg14[%c2_182, %c0_183, %c0_184], %285 {strides = array<i32>} : memref<4x8x1xf32, #tpu.memory_space<vmem>>, vector<1x8x1xf32>,
    %c3_185 = arith.constant 3 : index
    %c0_186 = arith.constant 0 : index
    %286 = memref.load %arg11[%c3_185, %c0_186] : memref<4x4xf32, #tpu.memory_space<smem>>
    %c0_187 = arith.constant 0 : index
    %c0_188 = arith.constant 0 : index
    %c0_189 = arith.constant 0 : index
    %287 = vector.load %arg17[%c0_187, %c0_188, %c0_189] : memref<4x8x8xf32, #tpu.memory_space<vmem>>, vector<1x8x8xf32>
    %288 = vector.shape_cast %287 : vector<1x8x8xf32> to vector<8x8xf32>
    %289 = vector.broadcast %286 : f32 to vector<8x8xf32>
    %290 = arith.mulf %289, %288 : vector<8x8xf32>
    %c3_190 = arith.constant 3 : index
    %291 = memref.load %arg12[%c3_190] : memref<4xf32, #tpu.memory_space<smem>>
    %292 = vector.broadcast %291 : f32 to vector<8x8xf32>
    %293 = arith.addf %290, %292 : vector<8x8xf32>
    %c3_191 = arith.constant 3 : index
    %c1_192 = arith.constant 1 : index
    %294 = memref.load %arg11[%c3_191, %c1_192] : memref<4x4xf32, #tpu.memory_space<smem>>
    %c1_193 = arith.constant 1 : index
    %c0_194 = arith.constant 0 : index
    %c0_195 = arith.constant 0 : index
    %295 = vector.load %arg17[%c1_193, %c0_194, %c0_195] : memref<4x8x8xf32, #tpu.memory_space<vmem>>, vector<1x8x8xf32>
    %296 = vector.shape_cast %295 : vector<1x8x8xf32> to vector<8x8xf32>
    %297 = vector.broadcast %294 : f32 to vector<8x8xf32>
    %298 = arith.mulf %297, %296 : vector<8x8xf32>
    %299 = arith.addf %293, %298 : vector<8x8xf32>
    %c3_196 = arith.constant 3 : index
    %c2_197 = arith.constant 2 : index
    %300 = memref.load %arg11[%c3_196, %c2_197] : memref<4x4xf32, #tpu.memory_space<smem>>
    %c2_198 = arith.constant 2 : index
    %c0_199 = arith.constant 0 : index
    %c0_200 = arith.constant 0 : index
    %301 = vector.load %arg17[%c2_198, %c0_199, %c0_200] : memref<4x8x8xf32, #tpu.memory_space<vmem>>, vector<1x8x8xf32>
    %302 = vector.shape_cast %301 : vector<1x8x8xf32> to vector<8x8xf32>
    %303 = vector.broadcast %300 : f32 to vector<8x8xf32>
    %304 = arith.mulf %303, %302 : vector<8x8xf32>
    %305 = arith.addf %299, %304 : vector<8x8xf32>
    %c3_201 = arith.constant 3 : index
    %c3_202 = arith.constant 3 : index
    %306 = memref.load %arg11[%c3_201, %c3_202] : memref<4x4xf32, #tpu.memory_space<smem>>
    %c3_203 = arith.constant 3 : index
    %c0_204 = arith.constant 0 : index
    %c0_205 = arith.constant 0 : index
    %307 = vector.load %arg17[%c3_203, %c0_204, %c0_205] : memref<4x8x8xf32, #tpu.memory_space<vmem>>, vector<1x8x8xf32>
    %308 = vector.shape_cast %307 : vector<1x8x8xf32> to vector<8x8xf32>
    %309 = vector.broadcast %306 : f32 to vector<8x8xf32>
    %310 = arith.mulf %309, %308 : vector<8x8xf32>
    %311 = arith.addf %305, %310 : vector<8x8xf32>
    %312 = vector.extract_strided_slice %95 {offsets = [0, 24], sizes = [8, 8], strides = [1, 1]} : vector<8x32xf32> to vector<8x8xf32>
    %313 = vector.extract_strided_slice %97 {offsets = [0, 24], sizes = [8, 8], strides = [1, 1]} : vector<8x32xf32> to vector<8x8xf32>
    %314 = vector.extract_strided_slice %99 {offsets = [0, 24], sizes = [8, 8], strides = [1, 1]} : vector<8x32xf32> to vector<8x8xf32>
    %cst_206 = arith.constant dense<0.000000e+00> : vector<8x8xf32>
    %315 = tpu.matmul %312, %313, %cst_206 {dimension_numbers = #tpu.dot_dimension_numbers<[1], [1], [0], [0], [0, 0, 1, 0], [], []>} : vector<8x8xf32>, vector<8x8xf32>, vector<8x8xf32> -> vector<8x8xf32>
    %316 = arith.addf %315, %311 : vector<8x8xf32>
    %c3_207 = arith.constant 3 : index
    %c0_208 = arith.constant 0 : index
    %c0_209 = arith.constant 0 : index
    %317 = vector.load %arg14[%c3_207, %c0_208, %c0_209] : memref<4x8x1xf32, #tpu.memory_space<vmem>>, vector<1x8x1xf32>
    %318 = vector.shape_cast %317 : vector<1x8x1xf32> to vector<8x1xf32>
    %c3_210 = arith.constant 3 : index
    %c0_211 = arith.constant 0 : index
    %c0_212 = arith.constant 0 : index
    %319 = vector.load %arg15[%c3_210, %c0_211, %c0_212] : memref<4x8x1xf32, #tpu.memory_space<vmem>>, vector<1x8x1xf32>
    %320 = vector.shape_cast %319 : vector<1x8x1xf32> to vector<8x1xf32>
    %cst_213 = arith.constant dense<0xFF800000> : vector<8xf32>
    %321 = vector.multi_reduction <maximumf>, %316, %cst_213 [1] : vector<8x8xf32> to vector<8xf32>
    %322 = vector.shape_cast %321 : vector<8xf32> to vector<8x1xf32>
    %323 = arith.maximumf %318, %322 : vector<8x1xf32>
    %324 = arith.subf %318, %323 : vector<8x1xf32>
    %325 = math.exp %324 : vector<8x1xf32>
    %326 = vector.broadcast %323 : vector<8x1xf32> to vector<8x8xf32>
    %327 = arith.subf %316, %326 : vector<8x8xf32>
    %328 = math.exp %327 : vector<8x8xf32>
    %329 = arith.mulf %325, %320 : vector<8x1xf32>
    %cst_214 = arith.constant dense<0.000000e+00> : vector<8xf32>
    %330 = vector.multi_reduction <add>, %328, %cst_214 [1] : vector<8x8xf32> to vector<8xf32>
    %331 = vector.shape_cast %330 : vector<8xf32> to vector<8x1xf32>
    %332 = arith.addf %329, %331 : vector<8x1xf32>
    %c3_215 = arith.constant 3 : index
    %c0_216 = arith.constant 0 : index
    %c0_217 = arith.constant 0 : index
    %333 = vector.load %arg15[%c3_215, %c0_216, %c0_217] : memref<4x8x1xf32, #tpu.memory_space<vmem>>, vector<1x8x1xf32>
    %334 = vector.shape_cast %333 : vector<1x8x1xf32> to vector<8x1xf32>
    %335 = vector.shape_cast %332 : vector<8x1xf32> to vector<1x8x1xf32>
    tpu.vector_store %arg15[%c3_215, %c0_216, %c0_217], %335 {strides = array<i32>} : memref<4x8x1xf32, #tpu.memory_space<vmem>>, vector<1x8x1xf32>,
    %c3_218 = arith.constant 3 : index
    %c0_219 = arith.constant 0 : index
    %c0_220 = arith.constant 0 : index
    %336 = vector.load %arg16[%c3_218, %c0_219, %c0_220] : memref<4x8x8xf32, #tpu.memory_space<vmem>>, vector<1x8x8xf32>
    %337 = vector.shape_cast %336 : vector<1x8x8xf32> to vector<8x8xf32>
    %338 = vector.broadcast %325 : vector<8x1xf32> to vector<8x8xf32>
    %339 = arith.mulf %338, %337 : vector<8x8xf32>
    %cst_221 = arith.constant dense<0.000000e+00> : vector<8x8xf32>
    %340 = tpu.matmul %328, %314, %cst_221 {dimension_numbers = #tpu.dot_dimension_numbers<[1], [0], [0], [1], [0, 0, 1, 1], [], []>} : vector<8x8xf32>, vector<8x8xf32>, vector<8x8xf32> -> vector<8x8xf32>
    %341 = arith.addf %339, %340 : vector<8x8xf32>
    %c3_222 = arith.constant 3 : index
    %c0_223 = arith.constant 0 : index
    %c0_224 = arith.constant 0 : index
    %342 = vector.load %arg16[%c3_222, %c0_223, %c0_224] : memref<4x8x8xf32, #tpu.memory_space<vmem>>, vector<1x8x8xf32>
    %343 = vector.shape_cast %342 : vector<1x8x8xf32> to vector<8x8xf32>
    %344 = vector.shape_cast %341 : vector<8x8xf32> to vector<1x8x8xf32>
    tpu.vector_store %arg16[%c3_222, %c0_223, %c0_224], %344 {strides = array<i32>} : memref<4x8x8xf32, #tpu.memory_space<vmem>>, vector<1x8x8xf32>,
    %c3_225 = arith.constant 3 : index
    %c0_226 = arith.constant 0 : index
    %c0_227 = arith.constant 0 : index
    %345 = vector.load %arg14[%c3_225, %c0_226, %c0_227] : memref<4x8x1xf32, #tpu.memory_space<vmem>>, vector<1x8x1xf32>
    %346 = vector.shape_cast %345 : vector<1x8x1xf32> to vector<8x1xf32>
    %347 = vector.shape_cast %323 : vector<8x1xf32> to vector<1x8x1xf32>
    tpu.vector_store %arg14[%c3_225, %c0_226, %c0_227], %347 {strides = array<i32>} : memref<4x8x1xf32, #tpu.memory_space<vmem>>, vector<1x8x1xf32>,
    %c0_i32_228 = arith.constant 0 : i32
    %348 = arith.cmpi eq, %arg2, %c0_i32_228 : i32
    %349 = arith.extui %348 : i1 to i32
    %c0_i32_229 = arith.constant 0 : i32
    %350 = arith.cmpi ne, %349, %c0_i32_229 : i32
    scf.if %350 {
      %c0_230 = arith.constant 0 : index
      %c0_231 = arith.constant 0 : index
      %c0_232 = arith.constant 0 : index
      %351 = vector.load %arg15[%c0_230, %c0_231, %c0_232] : memref<4x8x1xf32, #tpu.memory_space<vmem>>, vector<1x8x1xf32>
      %352 = vector.shape_cast %351 : vector<1x8x1xf32> to vector<8x1xf32>
      %353 = tpu.reciprocal %352 : vector<8x1xf32> -> vector<8x1xf32>
      %c0_233 = arith.constant 0 : index
      %c0_234 = arith.constant 0 : index
      %c0_235 = arith.constant 0 : index
      %354 = vector.load %arg16[%c0_233, %c0_234, %c0_235] : memref<4x8x8xf32, #tpu.memory_space<vmem>>, vector<1x8x8xf32>
      %355 = vector.shape_cast %354 : vector<1x8x8xf32> to vector<8x8xf32>
      %356 = vector.broadcast %353 : vector<8x1xf32> to vector<8x8xf32>
      %357 = arith.mulf %355, %356 : vector<8x8xf32>
      %c1_236 = arith.constant 1 : index
      %c0_237 = arith.constant 0 : index
      %c0_238 = arith.constant 0 : index
      %358 = vector.load %arg15[%c1_236, %c0_237, %c0_238] : memref<4x8x1xf32, #tpu.memory_space<vmem>>, vector<1x8x1xf32>
      %359 = vector.shape_cast %358 : vector<1x8x1xf32> to vector<8x1xf32>
      %360 = tpu.reciprocal %359 : vector<8x1xf32> -> vector<8x1xf32>
      %c1_239 = arith.constant 1 : index
      %c0_240 = arith.constant 0 : index
      %c0_241 = arith.constant 0 : index
      %361 = vector.load %arg16[%c1_239, %c0_240, %c0_241] : memref<4x8x8xf32, #tpu.memory_space<vmem>>, vector<1x8x8xf32>
      %362 = vector.shape_cast %361 : vector<1x8x8xf32> to vector<8x8xf32>
      %363 = vector.broadcast %360 : vector<8x1xf32> to vector<8x8xf32>
      %364 = arith.mulf %362, %363 : vector<8x8xf32>
      %c2_242 = arith.constant 2 : index
      %c0_243 = arith.constant 0 : index
      %c0_244 = arith.constant 0 : index
      %365 = vector.load %arg15[%c2_242, %c0_243, %c0_244] : memref<4x8x1xf32, #tpu.memory_space<vmem>>, vector<1x8x1xf32>
      %366 = vector.shape_cast %365 : vector<1x8x1xf32> to vector<8x1xf32>
      %367 = tpu.reciprocal %366 : vector<8x1xf32> -> vector<8x1xf32>
      %c2_245 = arith.constant 2 : index
      %c0_246 = arith.constant 0 : index
      %c0_247 = arith.constant 0 : index
      %368 = vector.load %arg16[%c2_245, %c0_246, %c0_247] : memref<4x8x8xf32, #tpu.memory_space<vmem>>, vector<1x8x8xf32>
      %369 = vector.shape_cast %368 : vector<1x8x8xf32> to vector<8x8xf32>
      %370 = vector.broadcast %367 : vector<8x1xf32> to vector<8x8xf32>
      %371 = arith.mulf %369, %370 : vector<8x8xf32>
      %c3_248 = arith.constant 3 : index
      %c0_249 = arith.constant 0 : index
      %c0_250 = arith.constant 0 : index
      %372 = vector.load %arg15[%c3_248, %c0_249, %c0_250] : memref<4x8x1xf32, #tpu.memory_space<vmem>>, vector<1x8x1xf32>
      %373 = vector.shape_cast %372 : vector<1x8x1xf32> to vector<8x1xf32>
      %374 = tpu.reciprocal %373 : vector<8x1xf32> -> vector<8x1xf32>
      %c3_251 = arith.constant 3 : index
      %c0_252 = arith.constant 0 : index
      %c0_253 = arith.constant 0 : index
      %375 = vector.load %arg16[%c3_251, %c0_252, %c0_253] : memref<4x8x8xf32, #tpu.memory_space<vmem>>, vector<1x8x8xf32>
      %376 = vector.shape_cast %375 : vector<1x8x8xf32> to vector<8x8xf32>
      %377 = vector.broadcast %374 : vector<8x1xf32> to vector<8x8xf32>
      %378 = arith.mulf %376, %377 : vector<8x8xf32>
      %379 = tpu.concatenate %357, %364, %371, %378 in 1 : vector<8x8xf32>, vector<8x8xf32>, vector<8x8xf32>, vector<8x8xf32> -> vector<8x32xf32>
      %c0_254 = arith.constant 0 : index
      %c0_255 = arith.constant 0 : index
      %380 = vector.load %arg7[%c0_254, %c0_255] : memref<32x32xf32, #tpu.memory_space<vmem>>, vector<32x32xf32>
      %cst_256 = arith.constant dense<0.000000e+00> : vector<8x32xf32>
      %381 = tpu.matmul %379, %380, %cst_256 {dimension_numbers = #tpu.dot_dimension_numbers<[1], [0], [0], [1], [0, 0, 1, 1], [], []>} : vector<8x32xf32>, vector<32x32xf32>, vector<8x32xf32> -> vector<8x32xf32>
      %c0_257 = arith.constant 0 : index
      %c0_258 = arith.constant 0 : index
      %382 = vector.load %arg8[%c0_257, %c0_258] : memref<1x32xf32, #tpu.memory_space<vmem>>, vector<1x32xf32>
      %383 = vector.broadcast %382 : vector<1x32xf32> to vector<8x32xf32>
      %384 = arith.addf %381, %383 : vector<8x32xf32>
      %c0_259 = arith.constant 0 : index
      %c0_260 = arith.constant 0 : index
      %c0_261 = arith.constant 0 : index
      %385 = vector.load %arg13[%c0_259, %c0_260, %c0_261] : memref<1x8x32xf32, #tpu.memory_space<vmem>>, vector<1x8x32xf32>
      %386 = vector.shape_cast %385 : vector<1x8x32xf32> to vector<8x32xf32>
      %387 = vector.shape_cast %384 : vector<8x32xf32> to vector<1x8x32xf32>
      tpu.vector_store %arg13[%c0_259, %c0_260, %c0_261], %387 {strides = array<i32>} : memref<1x8x32xf32, #tpu.memory_space<vmem>>, vector<1x8x32xf32>,
    } else {
    }
    return
  }
  func.func @transform_0(%arg0: i32, %arg1: i32, %arg2: i32) -> (i32, i32, i32) {
    %c0_i32 = arith.constant 0 : i32
    %c0_i32_0 = arith.constant 0 : i32
    return %arg0, %arg1, %c0_i32 : i32, i32, i32
  }
  func.func @transform_1(%arg0: i32, %arg1: i32, %arg2: i32) -> (i32, i32, i32) {
    %c0_i32 = arith.constant 0 : i32
    %c0_i32_0 = arith.constant 0 : i32
    return %arg0, %arg2, %c0_i32 : i32, i32, i32
  }
  func.func @transform_2(%arg0: i32, %arg1: i32, %arg2: i32) -> (i32, i32, i32) {
    %c0_i32 = arith.constant 0 : i32
    %c0_i32_0 = arith.constant 0 : i32
    return %arg0, %arg2, %c0_i32 : i32, i32, i32
  }
  func.func @transform_3(%arg0: i32, %arg1: i32, %arg2: i32) -> (i32, i32, i32) {
    %c0_i32 = arith.constant 0 : i32
    return %arg0, %arg1, %arg2 : i32, i32, i32
  }
  func.func @transform_4(%arg0: i32, %arg1: i32, %arg2: i32) -> (i32, i32) {
    %c0_i32 = arith.constant 0 : i32
    %c0_i32_0 = arith.constant 0 : i32
    %c0_i32_1 = arith.constant 0 : i32
    return %c0_i32, %c0_i32_0 : i32, i32
  }
  func.func @transform_5(%arg0: i32, %arg1: i32, %arg2: i32) -> (i32, i32) {
    %c0_i32 = arith.constant 0 : i32
    %c0_i32_0 = arith.constant 0 : i32
    %c0_i32_1 = arith.constant 0 : i32
    return %c0_i32, %c0_i32_0 : i32, i32
  }
  func.func @transform_6(%arg0: i32, %arg1: i32, %arg2: i32) -> (i32, i32) {
    %c0_i32 = arith.constant 0 : i32
    %c0_i32_0 = arith.constant 0 : i32
    %c0_i32_1 = arith.constant 0 : i32
    return %c0_i32, %c0_i32_0 : i32, i32
  }
  func.func @transform_7(%arg0: i32, %arg1: i32, %arg2: i32) -> i32 {
    %c0_i32 = arith.constant 0 : i32
    %c0_i32_0 = arith.constant 0 : i32
    return %c0_i32 : i32
  }
  func.func @transform_8(%arg0: i32, %arg1: i32, %arg2: i32) -> (i32, i32) {
    %c0_i32 = arith.constant 0 : i32
    %c0_i32_0 = arith.constant 0 : i32
    %c0_i32_1 = arith.constant 0 : i32
    return %c0_i32, %c0_i32_0 : i32, i32
  }
  func.func @transform_9(%arg0: i32, %arg1: i32, %arg2: i32) -> i32 {
    %c0_i32 = arith.constant 0 : i32
    %c0_i32_0 = arith.constant 0 : i32
    return %c0_i32 : i32
  }
  func.func @transform_10(%arg0: i32, %arg1: i32, %arg2: i32) -> (i32, i32, i32) {
    %c0_i32 = arith.constant 0 : i32
    %c0_i32_0 = arith.constant 0 : i32
    return %arg0, %arg1, %c0_i32 : i32, i32, i32
  }
}

</mosaic_0001>

<bundles_post_ra>
// kernel: tpu_custom_call.1
= control target key start
LH: loop header
LB: loop body
LE: loop exit
PB: predicated region body
PF: predicated region fallthrough
CT: control target
= control target key end

     0   :  { %s2663_s0 = inlined_call_operand.hbm [shape: f32[2,8,32], index: 0, kind: input, shape index: {}]   ;;  %s2664_s1 = inlined_call_operand.hbm [shape: f32[2,8,32], index: 1, kind: input, shape index: {}]   ;;  %s2665_s2 = inlined_call_operand.hbm [shape: f32[2,8,32], index: 2, kind: input, shape index: {}]   ;;  %s2666_s3 = inlined_call_operand.hbm [shape: f32[2,8,8], index: 3, kind: input, shape index: {}]   ;;  %s2667_s4 = inlined_call_operand.hbm [shape: f32[32,32], index: 4, kind: input, shape index: {}]   ;;  %s2668_s5 = inlined_call_operand.vmem [shape: f32[1,32], index: 5, kind: input, shape index: {}]   ;;  %s2669_s6 = inlined_call_operand.vmem [shape: f32[4,3], index: 6, kind: input, shape index: {}]   ;;  %s2670_s7 = inlined_call_operand.vmem [shape: f32[4], index: 7, kind: input, shape index: {}]   ;;  %s2671_s8 = inlined_call_operand.hbm [shape: f32[4,4], index: 8, kind: input, shape index: {}]   ;;  %s2672_s9 = inlined_call_operand.vmem [shape: f32[4], index: 9, kind: input, shape index: {}]   ;;  %s2673_s10 = inlined_call_operand.hbm [shape: f32[2,8,32], index: 10, kind: output, shape index: {}]  }
   0x1   :  { %2680 = sst [smem:[#allocation37_spill]] %s2663_s0 }
   0x2   :  { %2681 = sst [smem:[#allocation38_spill]] %s2664_s1 }
   0x3   :  { %2682 = sst [smem:[#allocation39_spill]] %s2667_s4 }
   0x4   :  { %2683 = sst [smem:[#allocation40_spill]] %s2669_s6 }
   0x5   :  { %2684 = sst [smem:[#allocation41_spill]] %s2670_s7 }
   0x6   :  { %2685 = sst [smem:[#allocation42_spill]] %s2671_s8 }
   0x7   :  { %2686 = sst [smem:[#allocation43_spill]] %s2672_s9 }
   0x8   :  { %15 = vsyncpa [#allocation7], 0 }
   0x9   :  { %17 = vsyncpa [#allocation7 + $0x1], 0 }
   0xa   :  { %18 = vsyncpa [#allocation12], 0 }
   0xb   :  { %20 = vsyncpa [#allocation12 + $0x1], 0 }
   0xc   :  { %21 = vsyncpa [#allocation15], 0 }
   0xd   :  { %23 = vsyncpa [#allocation15 + $0x1], 0 }
   0xe   :  { %24 = vsyncpa [#allocation10], 0 }
   0xf   :  { %25 = vsyncpa [#allocation19], 0 }
  0x10   :  { %26 = vsyncpa [#allocation9], 0 }
  0x11   :  { %27 = vsyncpa [#allocation8], 0 }
  0x12   :  { %29 = vsyncpa [#allocation8 + $0x1], 0  ;;  %s2181_s13 = smov 0   ;;  %s2183_s14 = smov 0  }
  0x13   :  { %s2185_s15 = smov 0   ;;  %s2187_s16 = smov 0  }
  0x14   :  { %s2189_s17 = smov 0   ;;  %s2191_s18 = smov 0  }
  0x15 LB: > { %2687 = sst [smem:[#allocation32_spill]] %s2088_s13  ;;  %s2212_s19 = sadd.s32 4294967295, %s2108_s18   ;;  %s2108_s18 = sphi %s2191_s18, %s35_s18   ;;  %s2104_s17 = sphi %s2189_s17, %s2724_s17   ;;  %s2100_s16 = sphi %s2187_s16, %s2723_s16   ;;  %s2096_s15 = sphi %s2185_s15, %s2727_s15   ;;  %s2092_s14 = sphi %s2183_s14, %s2726_s14   ;;  %s2088_s13 = sphi %s2181_s13, %s2725_s13  }
  0x16   : > { %2688 = sst [smem:[#allocation33_spill]] %s2104_s17  ;;  %p1540_p0 = scmp.ge.s32.totalorder %s2108_s18, 1 }
  0x17   : > { %p77_p1 = scmp.eq.s32.totalorder %s2212_s19, 0  ;;  %p327_p2 = scmp.lt.s32.totalorder %s2108_s18, 3 }
  0x18   : > { %s2689_s4 = sld [smem:[#allocation39_spill]]  ;;  %s2110_s24 = smov [#allocation16]  }
  0x19   : > { %p2220_p3 = pnand %p1540_p0, %p327_p2  ;;  %s340_s25 = sshll.u32 %s2110_s24, 4  ;;  %s341_s25 = int_to_ptr.vmem [resolvable:$true] %s340_s25 }
  0x1a   : > { %p1546_p6 = scmp.ge.s32.totalorder %s2108_s18, 2  ;;  %s2692_s7 = sld [smem:[#allocation41_spill]] }
  0x1b   : > { %p1645_p4 = pneg %p2220_p3  ;;  %s2111_s30 = smov 128  }
  0x1c   : > { %s2112_s11 = smov 8   ;;  %s2113_s12 = smov [#allocation18]  }
  0x1d   : > { %p2228_p5 = pnand %p1645_p4, %p77_p1  ;;  %s1539_s20 = sadd.s32 4294967294, %s2108_s18  }
  0x1e   : > { %s338_s22 = sshll.u32 %s2689_s4, 4  ;;  %s54_s21 = sadd.s32 1, %s2104_s17  ;;  %s339_s22 = int_to_ptr.hbm [resolvable:$true] %s338_s22 }
  0x1f   : > { %1648 = dma.hbm_to_vmem [thread:$0]  (!%p2228_p5), %s339_s22, 512, %s341_s25, [#allocation15], %s2111_s30, %s2111_s30, %s2112_s11  }
  0x20   : > { %s366_s29 = sshll.u32 %s2692_s7, 4  ;;  %p56_p7 = scmp.ge.s32.totalorder %s54_s21, 2  ;;  %s367_s29 = int_to_ptr.vmem [resolvable:$true] %s366_s29 }
  0x21   : > { %1654 = dma.vmem_to_smem (!%p2228_p5), %s367_s29, 16, %s2113_s12, [#allocation19]  }
  0x22   : > { %s63_s24 = sadd.s32 1, %s2096_s15  ;;  %p70_p8 = scmp.ne.s32.totalorder %s2096_s15, %s2092_s14 }
  0x23   : > { %p71_p9 = scmp.eq.s32.totalorder %s2108_s18, 0  ;;  %s2729_s21 = smov (%p56_p7, %s54_s21), 0 }
  0x24   : > { %2693 = sst [smem:[#allocation34_spill]] %s2729_s21  ;;  %p76_p11 = scmp.ne.s32.totalorder %s2092_s14, %s2088_s13 }
  0x25   : > { %p2248_p10 = por %p71_p9, %p70_p8  ;;  %s58_s25 = ssub.s32 %s2104_s17, %s2729_s21 }
  0x26   : > { %p314_p12 = scmp.eq.s32.totalorder %s2212_s19, 1  ;;  %p61_p13 = scmp.eq.s32.totalorder %s58_s25, 0 }
  0x27   : > { %p2259_p0 = por %p77_p1, %p76_p11  ;;  %p320_p4 = scmp.eq.s32.totalorder %s1539_s20, 1 }
  0x28   : > { %p2263_p2 = por %p314_p12, %p70_p8  ;;  %p1683_p9 = scmp.lt.s32.totalorder %s2108_s18, 2 }
  0x29   : > { %s2268_s29 = scalar_select %p61_p13, %s2096_s15, %s63_s24  }
  0x2a   : > { %p2270_p7 = por %p320_p4, %p76_p11  ;;  %s2677_s11 = sand.u32 1, %s2096_s15  }
  0x2b   : > { %2697 = sst [smem:[#allocation35_spill]] %s2268_s29  ;;  %s2277_s12 = sshll.u32 %s2104_s17, 3 }
  0x2c   : > { %s2698_s30 = scalar_select %p2270_p7, 1, 0 }
  0x2d   : > { %s2281_s25 = sshll.u32 %s2677_s11, 3  ;;  %p2285_p8 = pnand %p1683_p9, %p2248_p10 }
  0x2e   : > { %2699 = sst [smem:[#allocation36_spill]] %s2698_s30  ;;  %s2679_s20 = sand.u32 1, %s2108_s18  }
  0x2f   : > { %s2701_s1 = sld [smem:[#allocation38_spill]]  ;;  %s421_s17 = scalar_lea.vmem [#allocation11], %s2281_s25 }
  0x30   : > { %s430_s29 = sshll.u32 %s421_s17, 4  ;;  %s2297_s22 = scalar_lea.sflag [#allocation12], %s2679_s20  ;;  %s431_s29 = int_to_ptr.vmem [resolvable:$true] %s430_s29 }
  0x31   : > { %s2702_s6 = sld [smem:[#allocation40_spill]]  ;;  %s2115_s20 = smov [#allocation20]  }
  0x32   : > { %s2703_s8 = sld [smem:[#allocation42_spill]]  ;;  %s2116_s11 = smov [#allocation21]  }
  0x33   : > { %s2704_s9 = sld [smem:[#allocation43_spill]] }
  0x34   : > { %s2705_s0 = sld [smem:[#allocation37_spill]] }
  0x35   : > { %s426_s21 = scalar_lea.hbm %s2701_s1, %s2277_s12 }
  0x36   : > { %s428_s30 = sshll.u32 %s426_s21, 4  ;;  %s2114_s21 = smov [#allocation17]   ;;  %s429_s30 = int_to_ptr.hbm [resolvable:$true] %s428_s30 }
  0x37   : > { %1667 = dma.hbm_to_vmem [thread:$0]  (!%p2285_p8), %s429_s30, 128, %s431_s29, %s2297_s22  }
  0x38   : > { %s356_s7 = sshll.u32 %s2702_s6, 4  ;;  %s376_s17 = sshll.u32 %s2703_s8, 4  ;;  %s357_s7 = int_to_ptr.vmem [resolvable:$true] %s356_s7  ;;  %s377_s17 = int_to_ptr.hbm [resolvable:$true] %s376_s17 }
  0x39   : > { %1651 = dma.vmem_to_smem (!%p2228_p5), %s357_s7, 64, %s2114_s21, [#allocation10]  }
  0x3a   : > { %1657 = dma.hbm_to_smem (!%p2228_p5), %s377_s17, 64, %s2115_s20, [#allocation9]  }
  0x3b   : > { %s386_s13 = sshll.u32 %s2704_s9, 4  ;;  %s406_s7 = scalar_lea.hbm %s2705_s0, %s2277_s12  ;;  %s387_s13 = int_to_ptr.vmem [resolvable:$true] %s386_s13 }
  0x3c   : > { %1660 = dma.vmem_to_smem (!%p2228_p5), %s387_s13, 16, %s2116_s11, [#allocation19]  }
  0x3d   : > { %s408_s21 = sshll.u32 %s406_s7, 4  ;;  %s401_s6 = scalar_lea.vmem [#allocation6], %s2281_s25  ;;  %s409_s21 = int_to_ptr.hbm [resolvable:$true] %s408_s21 }
  0x3e   : > { %s410_s8 = sshll.u32 %s401_s6, 4  ;;  %s2706_s20 = sand.u32 1, %s2096_s15   ;;  %s411_s8 = int_to_ptr.vmem [resolvable:$true] %s410_s8 }
  0x3f   : > { %s398_s17 = scalar_lea.sflag [#allocation7], %s2706_s20  ;;  %s446_s30 = scalar_lea.hbm %s2665_s2, %s2277_s12 }
  0x40   : > { %1664 = dma.hbm_to_vmem [thread:$0]  (!%p2285_p8), %s409_s21, 128, %s411_s8, %s398_s17  }
  0x41   : > { %s448_s13 = sshll.u32 %s446_s30, 4  ;;  %s441_s11 = scalar_lea.vmem [#allocation13], %s2281_s25  ;;  %s449_s13 = int_to_ptr.hbm [resolvable:$true] %s448_s13 }
  0x42   : > { %s450_s1 = sshll.u32 %s441_s11, 4  ;;  %s467_s7 = scalar_lea.hbm %s2666_s3, %s2277_s12  ;;  %s451_s1 = int_to_ptr.vmem [resolvable:$true] %s450_s1 }
  0x43   : > { %1670 = dma.hbm_to_vmem [thread:$0]  (!%p2285_p8), %s449_s13, 128, %s451_s1, %s2297_s22  }
  0x44   : > { %s469_s0 = sshll.u32 %s467_s7, 4  ;;  %s461_s20 = scalar_lea.vmem [#allocation14], %s2281_s25  ;;  %s470_s0 = int_to_ptr.hbm [resolvable:$true] %s469_s0 }
  0x45   : > { %s471_s9 = sshll.u32 %s461_s20, 4  ;;  %s2707_s8 = sand.u32 1, %s2108_s18   ;;  %s472_s9 = int_to_ptr.vmem [resolvable:$true] %s471_s9 }
  0x46   : > { %s458_s21 = scalar_lea.sflag [#allocation15], %s2707_s8  ;;  %480 = sbr.rel (%p2220_p3) target bundleno = 1337 (0x539), region = 60 }
  0x47   : > { %1673 = dma.hbm_to_vmem [thread:$0]  (!%p2285_p8), %s470_s0, 128, %s472_s9, %s458_s21  }
  0x48   : > { %s2346_s17 = sand.u32 (!%p2220_p3), 1, %s2092_s14  }
  0x49   : > { %s2349_s22 = sshll.u32 (!%p2220_p3), %s2346_s17, 3  ;;  %s483_s12 = scalar_lea.sflag (!%p2220_p3), [#allocation7], %s2346_s17 }
  0x4a   : > { %s486_s25 = scalar_lea.vmem (!%p2220_p3), [#allocation6], %s2349_s22 }
  0x4b   : > { %2051 = dma.done.wait (%p2259_p0), %s483_s12, 128  }
  0x4c   : > { %2053 = vsyncadd (%p2259_p0), %s483_s12, 4294967168  ;;  %s492_s0 = sand.u32 1, %s2212_s19   ;;  %s496_s9 = scalar_lea.vmem [#allocation11], %s2349_s22 }
  0x4d   : > { %s493_s4 = scalar_lea.sflag [#allocation12], %s492_s0 }
  0x4e   : > { %2055 = dma.done.wait (%p2259_p0), %s493_s4, 256  }
  0x4f   : > { %2057 = vsyncadd (%p2259_p0), %s493_s4, 4294967040  ;;  %s506_s23 = scalar_lea.vmem [#allocation13], %s2349_s22  ;;  %s513_s26 = scalar_lea.sflag [#allocation15], %s492_s0 }
  0x50   : > { %s516_s29 = scalar_lea.vmem [#allocation14], %s2349_s22 }
  0x51   : > { %2059 = dma.done.wait (%p2259_p0), %s513_s26, 128  }
  0x52   : > { %2061 = vsyncadd (%p2259_p0), %s513_s26, 4294967168 }
  0x53   : > { %2063 = dma.done.wait (%p77_p1), [#allocation15], 512  }
  0x54   : > { %2065 = vsyncadd (%p77_p1), [#allocation15], 4294966784 }
  0x55   : > { %2067 = dma.done.wait (%p77_p1), [#allocation10], 64  }
  0x56   : > { %2069 = vsyncadd (%p77_p1), [#allocation10], 4294967232 }
  0x57   : > { %2071 = dma.done.wait (%p77_p1), [#allocation19], 16  }
  0x58   : > { %2073 = vsyncadd (%p77_p1), [#allocation19], 4294967280 }
  0x59   : > { %2075 = dma.done.wait (%p77_p1), [#allocation9], 64  }
  0x5a   : > { %2077 = vsyncadd (%p77_p1), [#allocation9], 4294967232 }
  0x5b   : > { %2079 = dma.done.wait (%p77_p1), [#allocation19], 16  }
  0x5c   : > { %2081 = vsyncadd (%p77_p1), [#allocation19], 4294967280 }
  0x5d   : > { %547 = sfence }
  0x5e   : > { %vm608_vm0 = vcmask 64512   ;;  %v731_v0 = vld [vmem:[%s496_s9] sm:$0xff]  ;;  %v2390_v2 = vld [vmem:[%s486_s25] sm:$0xff]  ;;  %s2394_s27 = sld [smem:[#allocation17]]  ;;  %s2117_s13 = smov 120   ;;  %vm599_vm13 = vcmask 7168  }
  0x5f   : > { %v613_v1 = vld [vmem:[%s516_s29] sm:$0xff]  ;;  %1583 = vmatpush.xpose.msk.msra.mxu0 %vm608_vm0, %v731_v0  ;;  %s2396_s19 = sld [smem:[#allocation17 + $0x1]]  ;;  %862 = vrot.lane.b32.xlu1 %v731_v0, %s2117_s13  ;;  %s2118_s1 = smov 112   ;;  %v2120_v45 = vmov -inf  }
  0x60   : > { %v614_v3 = vmul.f32 0.2631579, %v613_v1  ;;  %s2398_s30 = sld [smem:[#allocation17 + $0x2]]  ;;  %975 = vrot.lane.b32.xlu2 %v731_v0, %s2118_s1  ;;  %s2119_s25 = smov 104   ;;  %600 = vst.msk [vmem:[#allocation2] sm:$0xff] %vm599_vm13, %v2120_v45 }
  0x61   : > { %s2401_s11 = sld [smem:[#allocation17 + $0x80]]  ;;  %601 = vst.msk [vmem:[#allocation2 + $0x8] sm:$0xff] %vm599_vm13, %v2120_v45 }
  0x62   : > { %v615_v4 = vmul.f32 %v614_v3, %v614_v3  ;;  %v617_v5 = vadd.f32 1.0, %v614_v3  ;;  %1584 = vmatmul.msk.f32.vlgmr.msra.gmra.mxu0 %vm608_vm0, %v2390_v2  ;;  %s2404_s6 = sld [smem:[#allocation17 + $0x81]]  ;;  %602 = vst.msk [vmem:[#allocation2 + $0x10] sm:$0xff] %vm599_vm13, %v2120_v45 }
  0x63   : > { %s2406_s24 = sld [smem:[#allocation17 + $0x82]]  ;;  %603 = vst.msk [vmem:[#allocation2 + $0x18] sm:$0xff] %vm599_vm13, %v2120_v45 }
  0x64   : > { %v616_v6 = vmul.f32 %v615_v4, %v614_v3  ;;  %1758 = vrcp.f32 %v617_v5  ;;  %v632_v7 = vadd.f32 1.0, %v615_v4  ;;  %v627_v9 = vand.u32 2147483647, %v617_v5  ;;  %s2408_s7 = sld [smem:[#allocation17 + $0x100]] }
  0x65   : > { %v629_v11 = vand.u32 2147483648, %v617_v5  ;;  %s2410_s20 = sld [smem:[#allocation17 + $0x101]]  ;;  %vm623_vm1 = vweird.f32 %v617_v5  ;;  %v663_v15 = vstv %s2394_s27  ;;  %v666_v19 = vstv %s2396_s19 }
  0x66   : > { %v647_v8 = vadd.f32 1.0, %v616_v6  ;;  %1760 = vrcp.f32 %v632_v7  ;;  %s2412_s8 = sld [smem:[#allocation17 + $0x102]]  ;;  %vm2414_vm2 = vcmp.eq.f32.partialorder %v627_v9, 8.507059e+37  ;;  %v642_v14 = vand.u32 2147483647, %v632_v7 }
  0x67   : > { %s2419_s21 = sld [smem:[#allocation17 + $0x180]]  ;;  %v644_v18 = vand.u32 2147483648, %v632_v7  ;;  %860 = vrot.lane.b32.xlu1 %v2390_v2, %s2117_s13  ;;  %v630_v21 = vor.u32 1.1754944e-38, %v629_v11  ;;  %vm638_vm4 = vweird.f32 %v632_v7  ;;  %v670_v30 = vstv %s2398_s30 }
  0x68   : > { %1762 = vrcp.f32 %v647_v8  ;;  %s2422_s12 = sld [smem:[#allocation17 + $0x181]]  ;;  %v657_v23 = vand.u32 2147483647, %v647_v8  ;;  %1087 = vrot.lane.b32.xlu2 %v731_v0, %s2119_s25  ;;  %vm653_vm5 = vweird.f32 %v647_v8  ;;  %v659_v26 = vand.u32 2147483648, %v647_v8 }
  0x69   : > { %s2427_s0 = sld [smem:[#allocation17 + $0x182]]  ;;  %vm2435_vm8 = vcmp.eq.f32.partialorder %v642_v14, 8.507059e+37  ;;  %v645_v32 = vor.u32 1.1754944e-38, %v644_v18  ;;  %v680_v36 = vstv %s2401_s11  ;;  %v683_v37 = vstv %s2404_s6 }
  0x6a   : > { %v1759_v10 = vpop.eup %1758  ;;  %s2440_s4 = sld [smem:[#allocation18]]  ;;  %vm2442_vm10 = vcmp.eq.f32.partialorder %v657_v23, 8.507059e+37  ;;  %v660_v41 = vor.u32 1.1754944e-38, %v659_v26  ;;  %v697_v42 = vstv %s2408_s7  ;;  %v687_v46 = vstv %s2406_s24 }
  0x6b   : > { %v619_v12 = vmul.f32 %v1759_v10, %v617_v5  ;;  %vm624_vm3 = vweird.f32 %v1759_v10  ;;  %s2448_s9 = sld [smem:[#allocation18 + $0x1]]  ;;  %v700_v49 = vstv %s2410_s20 }
  0x6c   : > { %v1761_v16 = vpop.eup %1760  ;;  %vm2431_vm6 = vmor %vm623_vm1, %vm624_vm3  ;;  %s2458_s26 = sld [smem:[#allocation18 + $0x2]]  ;;  %v704_v50 = vstv %s2412_s8 }
  0x6d   : > { %v620_v17 = vsub.f32 1.0, %v619_v12  ;;  %v634_v22 = vmul.f32 %v1761_v16, %v632_v7  ;;  %vm639_vm7 = vweird.f32 %v1761_v16  ;;  %v714_v47 = vstv %s2419_s21  ;;  %s2470_s29 = sld [smem:[#allocation18 + $0x3]] }
  0x6e   : > { %v1763_v20 = vpop.eup %1762  ;;  %vm2453_vm11 = vmor %vm638_vm4, %vm639_vm7  ;;  %v717_v51 = vstv %s2422_s12  ;;  %s733_s27 = sld [smem:[#allocation20]] }
  0x6f   : > { %v621_v24 = vmul.f32 %v1759_v10, %v620_v17  ;;  %v649_v25 = vmul.f32 %v1763_v20, %v647_v8  ;;  %v635_v28 = vsub.f32 1.0, %v634_v22  ;;  %vm654_vm9 = vweird.f32 %v1763_v20  ;;  %973 = vrot.lane.b32.xlu1 %v2390_v2, %s2118_s1  ;;  %s737_s19 = sld [smem:[#allocation21]] }
  0x70   : > { %vm2464_vm12 = vmor %vm653_vm5, %vm654_vm9  ;;  %1085 = vrot.lane.b32.xlu2 %v2390_v2, %s2119_s25  ;;  %v721_v59 = vstv %s2427_s0  ;;  %v674_v8 = vstv %s2440_s4  ;;  %s1580_s30 = sld [smem:[#allocation20 + $0x1]] }
  0x71   : > { %v622_v31 = vadd.f32 %v1759_v10, %v621_v24  ;;  %v650_v33 = vsub.f32 1.0, %v649_v25  ;;  %v636_v34 = vmul.f32 %v1761_v16, %v635_v28  ;;  %v691_v9 = vstv %s2448_s9  ;;  %s1581_s11 = sld [smem:[#allocation20 + $0x2]] }
  0x72   : > { %s1582_s6 = sld [smem:[#allocation20 + $0x3]] }
  0x73   : > { %v626_v38 = vsel %vm2431_vm6, %v1759_v10, %v622_v31  ;;  %v651_v40 = vmul.f32 %v1763_v20, %v650_v33  ;;  %v637_v44 = vadd.f32 %v1761_v16, %v636_v34  ;;  %v708_v10 = vstv %s2458_s26  ;;  %s1586_s24 = sld [smem:[#allocation20 + $0x80]] }
  0x74   : > { %v631_v43 = vsel %vm2414_vm2, %v630_v21, %v626_v38  ;;  %v735_v26 = vstv %s733_s27  ;;  %s1587_s7 = sld [smem:[#allocation21 + $0x1]] }
  0x75   : > { %v652_v48 = vadd.f32 %v1763_v20, %v651_v40  ;;  %v641_v52 = vsel %vm2453_vm11, %v1761_v16, %v637_v44  ;;  %v664_v53 = vmul.f32 %v663_v15, %v631_v43  ;;  %v681_v54 = vmul.f32 %v680_v36, %v631_v43  ;;  %s1588_s20 = sld [smem:[#allocation20 + $0x81]] }
  0x76   : > { %v698_v55 = vmul.f32 %v697_v42, %v631_v43  ;;  %v646_v56 = vsel %vm2435_vm8, %v645_v32, %v641_v52  ;;  %v715_v58 = vmul.f32 %v714_v47, %v631_v43  ;;  %v725_v15 = vstv %s2470_s29  ;;  %s1589_s8 = sld [smem:[#allocation20 + $0x82]] }
  0x77   : > { %v656_v57 = vsel %vm2464_vm12, %v1763_v20, %v652_v48  ;;  %v667_v61 = vmul.f32 %v666_v19, %v646_v56  ;;  %v684_v62 = vmul.f32 %v683_v37, %v646_v56  ;;  %v701_v63 = vmul.f32 %v700_v49, %v646_v56  ;;  %s1590_s21 = sld [smem:[#allocation20 + $0x83]] }
  0x78   : > { %v661_v60 = vsel %vm2442_vm10, %v660_v41, %v656_v57  ;;  %v718_v3 = vmul.f32 %v717_v51, %v646_v56  ;;  %v738_v28 = vstv %s737_s19  ;;  %v747_v34 = vstv %s1581_s11  ;;  %v2540_v57 = vld [vmem:[%s506_s23] sm:$0xff]  ;;  %s1602_s12 = sld [smem:[#allocation20 + $0x180]]  ;;  %s1612_s11 = sshll.u32 %s2100_s16, 3 }
  0x79   : > { %v671_v0 = vmul.f32 %v670_v30, %v661_v60  ;;  %v688_v1 = vmul.f32 %v687_v46, %v661_v60  ;;  %v705_v2 = vmul.f32 %v704_v50, %v661_v60  ;;  %v668_v4 = vadd.f32 %v667_v61, %v664_v53  ;;  %v2528_v53 = vld [vmem:[#allocation2] sm:$0xff]  ;;  %830 = vmatpush.msra.mxu1 %v2540_v57  ;;  %s1603_s0 = sld [smem:[#allocation21 + $0x3]] }
  0x7a   : > { %v685_v5 = vadd.f32 %v684_v62, %v681_v54  ;;  %v702_v6 = vadd.f32 %v701_v63, %v698_v55  ;;  %v722_v7 = vmul.f32 %v721_v59, %v661_v60  ;;  %v719_v11 = vadd.f32 %v718_v3, %v715_v58  ;;  %s1604_s4 = sld [smem:[#allocation20 + $0x181]] }
  0x7b   : > { %v672_v12 = vadd.f32 %v671_v0, %v668_v4  ;;  %v742_v30 = vstv %s1580_s30  ;;  %v752_v38 = vstv %s1582_s6  ;;  %v2121_v46 = vmov 0   ;;  %s1605_s9 = sld [smem:[#allocation20 + $0x182]]  ;;  %s2125_s30 = smov 16  }
  0x7c   : > { %v689_v13 = vadd.f32 %v688_v1, %v685_v5  ;;  %v706_v14 = vadd.f32 %v705_v2, %v702_v6  ;;  %v723_v16 = vadd.f32 %v722_v7, %v719_v11  ;;  %1754 = vset.pattern.permute.xlu0 %v2121_v46  ;;  %1755 = vset.pattern.permute.xlu2 %v2121_v46  ;;  %v2122_v47 = vmov 0.0   ;;  %s1606_s26 = sld [smem:[#allocation20 + $0x183]] }
  0x7d   : > { %v675_v17 = vadd.f32 %v674_v8, %v672_v12  ;;  %1756 = vset.pattern.permute.xlu1 %v2121_v46  ;;  %607 = vst.msk [vmem:[#allocation3 + $0x18] sm:$0xff] %vm599_vm13, %v2122_v47  ;;  %v840_v58 = vstv %s1586_s24  ;;  %v843_v59 = vstv %s1587_s7  ;;  %v847_v60 = vstv %s1588_s20  ;;  %s1594_s23 = sld [smem:[#allocation20 + $0x100]]  ;;  %s1328_s7 = scalar_lea.hbm %s2673_s10, %s1612_s11 }
  0x7e   : > { %v692_v18 = vadd.f32 %v691_v9, %v689_v13  ;;  %v709_v19 = vadd.f32 %v708_v10, %v706_v14  ;;  %v726_v20 = vadd.f32 %v725_v15, %v723_v16  ;;  %604 = vst.msk [vmem:[#allocation3] sm:$0xff] %vm599_vm13, %v2122_v47  ;;  %v852_v61 = vstv %s1589_s8  ;;  %s1595_s29 = sld [smem:[#allocation21 + $0x2]] }
  0x7f   : > { %v676_v21 = vmax.f32 %v675_v17, 0.0  ;;  %605 = vst.msk [vmem:[#allocation3 + $0x8] sm:$0xff] %vm599_vm13, %v2122_v47  ;;  %v857_v1 = vstv %s1590_s21  ;;  %v1065_v2 = vstv %s1602_s12  ;;  %v1068_v3 = vstv %s1603_s0  ;;  %s1596_s27 = sld [smem:[#allocation20 + $0x101]]  ;;  %s594_s21 = scalar_lea.vmem [#allocation22], %s2349_s22 }
  0x80   : > { %v693_v22 = vmax.f32 %v692_v18, 0.0  ;;  %v710_v23 = vmax.f32 %v709_v19, 0.0  ;;  %v727_v24 = vmax.f32 %v726_v20, 0.0  ;;  %606 = vst.msk [vmem:[#allocation3 + $0x10] sm:$0xff] %vm599_vm13, %v2122_v47  ;;  %v1072_v4 = vstv %s1604_s4  ;;  %s1597_s19 = sld [smem:[#allocation20 + $0x102]]  ;;  %s1330_s12 = sshll.u32 %s594_s21, 4  ;;  %s1331_s12 = int_to_ptr.vmem [resolvable:$true] %s1330_s12 }
  0x81   : > { %678 = vst.msk [vmem:[#allocation5] sm:$0xff] %vm608_vm0, %v676_v21  ;;  %v1077_v8 = vstv %s1605_s9  ;;  %s1332_s0 = sshll.u32 %s1328_s7, 4  ;;  %s1317_s4 = scalar_lea.sflag [#allocation8], %s2346_s17  ;;  %s1333_s0 = int_to_ptr.hbm [resolvable:$true] %s1332_s0 }
  0x82   : > { %695 = vst.msk [vmem:[#allocation5 + $0x8] sm:$0xff] %vm608_vm0, %v693_v22  ;;  %v1082_v9 = vstv %s1606_s26  ;;  %s2012_s9 = sshra.s32 %s1333_s0, 4  ;;  %s2013_s9 = int_to_ptr.hbm [resolvable:$true] %s2012_s9 }
  0x83   : > { %712 = vst.msk [vmem:[#allocation5 + $0x10] sm:$0xff] %vm608_vm0, %v710_v23  ;;  %s2014_s16 = scalar_lea.hbm %s2013_s9, 8  ;;  %p2019_p10 = scmp.lt.s32.totalorder %s2013_s9, %s2673_s10 }
  0x84   : > { %729 = vst.msk [vmem:[#allocation5 + $0x18] sm:$0xff] %vm608_vm0, %v727_v24  ;;  %p2015_p1 = scmp.ne.s32.totalorder %s2013_s9, %s2014_s16 }
  0x85   : > { %609 = vst.msk [vmem:[#allocation4] sm:$0xff] %vm608_vm0, %v2122_v47 }
  0x86   : > { %610 = vst.msk [vmem:[#allocation4 + $0x8] sm:$0xff] %vm608_vm0, %v2122_v47  ;;  %v965_v45 = vstv %s1597_s19  ;;  %p2016_p3 = pnand %p2015_p1, %p2263_p2 }
  0x87   : > { %611 = vst.msk [vmem:[#allocation4 + $0x10] sm:$0xff] %vm608_vm0, %v2122_v47 }
  0x88   : > { %v2496_v25 = vld [vmem:[#allocation5] sm:$0xff]  ;;  %612 = vst.msk [vmem:[#allocation4 + $0x18] sm:$0xff] %vm608_vm0, %v2122_v47  ;;  %p2017_p5 = pneg %p2016_p3 }
  0x89   : > { %v736_v27 = vmul.f32 %v735_v26, %v2496_v25  ;;  %v2499_v29 = vld [vmem:[#allocation5 + $0x8] sm:$0xff]  ;;  %v841_v62 = vmul.f32 %v840_v58, %v2496_v25  ;;  %v1066_v6 = vmul.f32 %v1065_v2, %v2496_v25 }
  0x8a   : > { %v743_v32 = vmul.f32 %v742_v30, %v2499_v29  ;;  %v2502_v33 = vld [vmem:[#allocation5 + $0x10] sm:$0xff]  ;;  %v848_v63 = vmul.f32 %v847_v60, %v2499_v29  ;;  %v1073_v7 = vmul.f32 %v1072_v4, %v2499_v29 }
  0x8b   : > { %v739_v31 = vadd.f32 %v738_v28, %v736_v27  ;;  %v748_v36 = vmul.f32 %v747_v34, %v2502_v33  ;;  %v2505_v37 = vld [vmem:[#allocation5 + $0x18] sm:$0xff]  ;;  %v853_v0 = vmul.f32 %v852_v61, %v2502_v33  ;;  %v844_v5 = vadd.f32 %v843_v59, %v841_v62 }
  0x8c   : > { %v753_v40 = vmul.f32 %v752_v38, %v2505_v37  ;;  %v858_v11 = vmul.f32 %v857_v1, %v2505_v37  ;;  %v1069_v12 = vadd.f32 %v1068_v3, %v1066_v6  ;;  %v1078_v13 = vmul.f32 %v1077_v8, %v2502_v33 }
  0x8d   : > { %v744_v35 = vadd.f32 %v743_v32, %v739_v31  ;;  %v849_v10 = vadd.f32 %v848_v63, %v844_v5  ;;  %v1083_v16 = vmul.f32 %v1082_v9, %v2505_v37  ;;  %v966_v47 = vmul.f32 %v965_v45, %v2502_v33 }
  0x8e   : > { %v1074_v15 = vadd.f32 %v1073_v7, %v1069_v12 }
  0x8f   : > { %v749_v39 = vadd.f32 %v748_v36, %v744_v35  ;;  %v854_v14 = vadd.f32 %v853_v0, %v849_v10  ;;  %v2568_v35 = vld [vmem:[#allocation2 + $0x8] sm:$0xff] }
  0x90   : > { %v1079_v18 = vadd.f32 %v1078_v13, %v1074_v15 }
  0x91   : > { %v754_v41 = vadd.f32 %v753_v40, %v749_v39  ;;  %v859_v17 = vadd.f32 %v858_v11, %v854_v14  ;;  %v953_v39 = vstv %s1594_s23 }
  0x92   : > { %v1084_v21 = vadd.f32 %v1083_v16, %v1079_v18  ;;  %v954_v40 = vmul.f32 %v953_v39, %v2496_v25 }
  0xba   : > { %v976_v49 = vpop.permute.xlu2 %975 }
  0xbb   : > { %1599 = vmatpush.xpose.msk.msrb.mxu1 %vm608_vm0, %v976_v49 }
  0xc2   : > { %v1088_v51 = vpop.permute.xlu2 %1087 }
  0xc3   : > { %1607 = vmatpush.xpose.msk.msrb.mxu0 %vm608_vm0, %v1088_v51 }
  0xca   : > { %v1086_v52 = vpop.permute.xlu2 %1085 }
  0xcb   : > { %1608 = vmatmul.msk.f32.vlgmr.msrb.gmra.mxu0 %vm608_vm0, %v1086_v52  ;;  %v1114_v52 = vld [vmem:[#allocation2 + $0x18] sm:$0xff] }
  0xd1   : > { %v863_v48 = vpop.permute.xlu1 %862 }
  0xd2   : > { %1591 = vmatpush.xpose.msk.msra.mxu2 %vm608_vm0, %v863_v48 }
  0xd9   : > { %v861_v50 = vpop.permute.xlu1 %860 }
  0xda   : > { %1592 = vmatmul.msk.f32.vlgmr.msra.gmra.mxu2 %vm608_vm0, %v861_v50 }
  0xdf   : > { %v778_v42 = vpop.f32.mrf.mxu0 }
  0xe0   : > { %v2508_v43 = vadd.f32 %v778_v42, %v754_v41  ;;  %v956_v41 = vstv %s1595_s29  ;;  %v960_v42 = vstv %s1596_s27  ;;  %s2018_s29 = scalar_lea.hbm %s2673_s10, 16 }
  0xe1   : > { %v974_v32 = vpop.permute.xlu1 %973  ;;  %p2020_p11 = scmp.lt.s32.totalorder %s2018_s29, %s2014_s16 }
  0xe2   : > { %v783_v44 = vsel %vm608_vm0, %v2508_v43, -inf }
  0xe3   : > { %784 = vmax.xlane.f32.xlu0 %v783_v44  ;;  %v961_v44 = vmul.f32 %v960_v42, %v2499_v29  ;;  %p2021_p12 = por %p2020_p11, %p2019_p10 }
  0xe5   : > { %p2022_p13 = pnand %p2021_p12, %p2017_p5 }
 0x148   : > { %v1110_v23 = vpop.f32.mrf.mxu0 }
 0x149   : > { %v2557_v27 = vadd.f32 %v1110_v23, %v1084_v21 }
 0x14b   : > { %v1117_v30 = vsel %vm608_vm0, %v2557_v27, -inf }
 0x156   : > { %v785_v54 = vpop.xlane.xlu0 %784 }
 0x157   : > { %v2531_v55 = vmax.f32 %v2528_v53, %v785_v54 }
 0x159   : > { %v787_v56 = vsub.f32 %v2528_v53, %v2531_v55  ;;  %837 = vst.msk [vmem:[#allocation2] sm:$0xff] %vm599_vm13, %v2531_v55  ;;  %792 = vperm.xlu0 %1754, %v2531_v55  }
 0x15d   : > { %v885_v19 = vpop.f32.mrf.mxu2 }
 0x15e   : > { %v2552_v20 = vadd.f32 %v885_v19, %v859_v17 }
 0x160   : > { %v892_v26 = vsel %vm608_vm0, %v2552_v20, -inf }
 0x161   : > { %893 = vmax.xlane.f32.xlu1 %v892_v26 }
 0x183   : > { %1118 = vmax.xlane.f32.xlu0 %v1117_v30 }
 0x197   : > { %922 = vrot.lane.b32.xlu0 %v2540_v57, %s2117_s13  ;;  %s1598_s13 = sld [smem:[#allocation20 + $0x103]] }
 0x19d   : > { %v970_v48 = vstv %s1598_s13 }
 0x19e   : > { %v971_v51 = vmul.f32 %v970_v48, %v2505_v37  ;;  %v1002_v37 = vld [vmem:[#allocation2 + $0x10] sm:$0xff] }
 0x1cb   : > { %v793_v22 = vpop.permute.xlu0 %792 }
 0x1cc   : > { %v795_v24 = vsub.f32 %v2508_v43, %v793_v22  ;;  %v957_v43 = vadd.f32 %v956_v41, %v954_v40  ;;  %v1116_v22 = vld [vmem:[#allocation3 + $0x18] sm:$0xff] }
 0x1ce   : > { %v796_v28 = vmul.f32 1.442695, %v795_v24  ;;  %v962_v46 = vadd.f32 %v961_v44, %v957_v43 }
 0x1d0   : > { %1764 = vpow2.f32 %v796_v28  ;;  %v967_v50 = vadd.f32 %v966_v47, %v962_v46 }
 0x1d2   : > { %v972_v58 = vadd.f32 %v971_v51, %v967_v50 }
 0x1d4   : > { %v894_v34 = vpop.xlane.xlu1 %893 }
 0x1d5   : > { %v2571_v36 = vmax.f32 %v2568_v35, %v894_v34  ;;  %v1139_v34 = vld [vmem:[#allocation4 + $0x18] sm:$0xff] }
 0x1d6   : > { %v2561_v31 = vpop.eup %1764 }
 0x1d7   : > { %1585 = vmatmul.msk.f32.vlgmr.msra.gmra.mxu1 %vm608_vm0, %v2561_v31  ;;  %v896_v38 = vsub.f32 %v2568_v35, %v2571_v36  ;;  %950 = vst.msk [vmem:[#allocation2 + $0x8] sm:$0xff] %vm599_vm13, %v2571_v36  ;;  %v799_v13 = vsel %vm608_vm0, %v2561_v31, 0.0 }
 0x1d9   : > { %v897_v23 = vmul.f32 1.442695, %v896_v38 }
 0x1df   : > { %1600 = vmatmul.msk.f32.vlgmr.msrb.gmra.mxu1 %vm608_vm0, %v974_v32  ;;  %v788_v32 = vmul.f32 1.442695, %v787_v56 }
 0x1f6   : > { %v1119_v54 = vpop.xlane.xlu0 %1118 }
 0x1f7   : > { %v1120_v25 = vmax.f32 %v1114_v52, %v1119_v54 }
 0x1f9   : > { %v1121_v59 = vsub.f32 %v1114_v52, %v1120_v25  ;;  %1174 = vst.msk [vmem:[#allocation2 + $0x18] sm:$0xff] %vm599_vm13, %v1120_v25  ;;  %v782_v52 = vld [vmem:[#allocation3] sm:$0xff] }
 0x1fb   : > { %v1122_v11 = vmul.f32 1.442695, %v1121_v59 }
 0x209   : > { %v923_v33 = vpop.permute.xlu0 %922 }
 0x20a   : > { %943 = vmatpush.msra.mxu3 %v923_v33 }
 0x254   : > { %v2580_v49 = vpop.f32.mrf.mxu1 }
 0x25c   : > { %v998_v60 = vpop.f32.mrf.mxu1 }
 0x25d   : > { %v999_v61 = vadd.f32 %v998_v60, %v972_v58 }
 0x25f   : > { %v1005_v29 = vsel %vm608_vm0, %v999_v61, -inf }
 0x260   : > { %1006 = vmax.xlane.f32.xlu2 %v1005_v29 }
 0x278   : > { %901 = vperm.xlu2 %1755, %v2571_v36   ;;  %v891_v36 = vld [vmem:[#allocation3 + $0x8] sm:$0xff] }
 0x280   : > { %1126 = vperm.xlu2 %1755, %v1120_v25  }
 0x288   : > { %1146 = vrot.lane.b32.xlu2 %v2540_v57, %s2119_s25  ;;  %s2124_s25 = smov 24  }
 0x2d3   : > { %v1007_v62 = vpop.xlane.xlu2 %1006 }
 0x2d4   : > { %v1008_v63 = vmax.f32 %v1002_v37, %v1007_v62 }
 0x2d6   : > { %v1009_v0 = vsub.f32 %v1002_v37, %v1008_v63  ;;  %1062 = vst.msk [vmem:[#allocation2 + $0x10] sm:$0xff] %vm599_vm13, %v1008_v63  ;;  %1014 = vperm.xlu1 %1756, %v1008_v63  }
 0x2d8   : > { %v1010_v14 = vmul.f32 1.442695, %v1009_v0 }
 0x2db   : > { %v902_v1 = vpop.permute.xlu2 %901 }
 0x2dc   : > { %v904_v2 = vsub.f32 %v2552_v20, %v902_v1 }
 0x2de   : > { %v905_v3 = vmul.f32 1.442695, %v904_v2  ;;  %1034 = vrot.lane.b32.xlu1 %v2540_v57, %s2118_s1  ;;  %s2123_s1 = smov 8  }
 0x2e0   : > { %1766 = vpow2.f32 %v905_v3  ;;  %v1004_v3 = vld [vmem:[#allocation3 + $0x10] sm:$0xff] }
 0x2e3   : > { %v1127_v4 = vpop.permute.xlu2 %1126 }
 0x2e4   : > { %v1129_v5 = vsub.f32 %v2557_v27, %v1127_v4 }
 0x2e6   : > { %v1767_v6 = vpop.eup %1766  ;;  %v1130_v7 = vmul.f32 1.442695, %v1129_v5 }
 0x2e7   : > { %1593 = vmatmul.msk.f32.vlgmr.msra.gmra.mxu3 %vm608_vm0, %v1767_v6  ;;  %v908_v12 = vsel %vm608_vm0, %v1767_v6, 0.0 }
 0x2e8   : > { %1768 = vpow2.f32 %v1130_v7 }
 0x2e9   : > { %1770 = vpow2.f32 %v1122_v11 }
 0x2ea   : > { %1772 = vpow2.f32 %v1010_v14 }
 0x2eb   : > { %v1147_v8 = vpop.permute.xlu2 %1146 }
 0x2ec   : > { %1167 = vmatpush.msrb.mxu2 %v1147_v8  ;;  %v914_v8 = vld [vmem:[#allocation4 + $0x8] sm:$0xff] }
 0x2ee   : > { %v1769_v9 = vpop.eup %1768 }
 0x2ef   : > { %1609 = vmatmul.msk.f32.vlgmr.msrb.gmra.mxu2 %vm608_vm0, %v1769_v9  ;;  %v1133_v10 = vsel %vm608_vm0, %v1769_v9, 0.0  ;;  %v1771_v57 = vpop.eup %1770 }
 0x2f0   : > { %1134 = vadd.xlane.f32.xlu0 %v1133_v10  ;;  %v2599_v15 = vpop.eup %1772  ;;  %v1132_v24 = vmul.f32 %v1771_v57, %v1116_v22 }
 0x2f1   : > { %v1020_v4 = vmul.f32 %v2599_v15, %v1004_v3 }
 0x304   : > { %1142 = vperm.xlu0 %1754, %v1771_v57  }
 0x308   : > { %909 = vadd.xlane.f32.xlu1 %v908_v12  ;;  %v1027_v12 = vld [vmem:[#allocation4 + $0x10] sm:$0xff] }
 0x310   : > { %800 = vadd.xlane.f32.xlu1 %v799_v13 }
 0x329   : > { %1030 = vperm.xlu1 %1756, %v2599_v15  }
 0x348   : > { %v1015_v16 = vpop.permute.xlu1 %1014 }
 0x349   : > { %v1017_v17 = vsub.f32 %v999_v61, %v1015_v16 }
 0x34b   : > { %v1018_v18 = vmul.f32 1.442695, %v1017_v17 }
 0x34d   : > { %1774 = vpow2.f32 %v1018_v18 }
 0x34e   : > { %1776 = vpow2.f32 %v897_v23 }
 0x350   : > { %v1035_v19 = vpop.permute.xlu1 %1034 }
 0x351   : > { %1055 = vmatpush.msrb.mxu3 %v1035_v19 }
 0x353   : > { %v1775_v20 = vpop.eup %1774 }
 0x354   : > { %1601 = vmatmul.msk.f32.vlgmr.msrb.gmra.mxu3 %vm608_vm0, %v1775_v20  ;;  %v1021_v21 = vsel %vm608_vm0, %v1775_v20, 0.0  ;;  %v1777_v28 = vpop.eup %1776 }
 0x355   : > { %1022 = vadd.xlane.f32.xlu2 %v1021_v21  ;;  %v907_v46 = vmul.f32 %v1777_v28, %v891_v36 }
 0x363   : > { %v1135_v26 = vpop.xlane.xlu0 %1134 }
 0x364   : > { %v1136_v27 = vadd.f32 %v1135_v26, %v1132_v24 }
 0x366   : > { %1137 = vst.msk [vmem:[#allocation3 + $0x18] sm:$0xff] %vm599_vm13, %v1136_v27 }
 0x36a   : > { %v945_v9 = vpop.f32.mrf.mxu3 }
 0x36d   : > { %917 = vperm.xlu2 %1755, %v1777_v28   ;;  %v1244_v30 = vld [vmem:[#allocation3 + $0x18] sm:$0xff] }
 0x36e   : > { %1778 = vrcp.f32 %v1244_v30  ;;  %v1256_v42 = vand.u32 2147483648, %v1244_v30  ;;  %v1254_v45 = vand.u32 2147483647, %v1244_v30  ;;  %vm1250_vm15 = vweird.f32 %v1244_v30 }
 0x36f   : > { %1780 = vpow2.f32 %v788_v32 }
 0x370   : > { %v1257_v55 = vor.u32 1.1754944e-38, %v1256_v42  ;;  %vm1255_vm2 = vcmp.eq.f32.partialorder %v1254_v45, 8.507059e+37 }
 0x372   : > { %v1169_v41 = vpop.f32.mrf.mxu2 }
 0x374   : > { %v1779_v31 = vpop.eup %1778 }
 0x375   : > { %v1246_v39 = vmul.f32 %v1779_v31, %v1244_v30  ;;  %vm1251_vm14 = vweird.f32 %v1779_v31  ;;  %v1781_v50 = vpop.eup %1780 }
 0x376   : > { %v1143_v40 = vpop.permute.xlu0 %1142  ;;  %vm1252_vm1 = vmor %vm1250_vm15, %vm1251_vm14  ;;  %v798_v54 = vmul.f32 %v1781_v50, %v782_v52  ;;  %v1284_v52 = vld [vmem:[#allocation16 + $0x8] sm:$0xff]  ;;  %vm1279_vm15 = vcmask 130048  }
 0x377   : > { %v1145_v35 = vmul.f32 %v1143_v40, %v1139_v34  ;;  %v1247_v38 = vsub.f32 1.0, %v1246_v39 }
 0x379   : > { %v1172_v43 = vadd.f32 %v1169_v41, %v1145_v35  ;;  %v1248_v44 = vmul.f32 %v1779_v31, %v1247_v38 }
 0x37b   : > { %1173 = vst.msk [vmem:[#allocation4 + $0x18] sm:$0xff] %vm608_vm0, %v1172_v43  ;;  %v910_v47 = vpop.xlane.xlu1 %909  ;;  %v1249_v48 = vadd.f32 %v1779_v31, %v1248_v44 }
 0x37c   : > { %v911_v53 = vadd.f32 %v910_v47, %v907_v46 }
 0x37d   : > { %v1253_v56 = vsel %vm1252_vm1, %v1779_v31, %v1249_v48  ;;  %v805_v48 = vld [vmem:[#allocation4] sm:$0xff]  ;;  %vm1281_vm1 = vcmask 195584  }
 0x37e   : > { %912 = vst.msk [vmem:[#allocation3 + $0x8] sm:$0xff] %vm599_vm13, %v911_v53  ;;  %v1258_v51 = vsel %vm1255_vm2, %v1257_v55, %v1253_v56  ;;  %vm1291_vm2 = vcmask 261120  }
 0x37f   : > { %1262 = vperm.xlu1 %1756, %v1258_v51   ;;  %v1285_v51 = vld [vmem:[#allocation16 + $0x10] sm:$0xff] }
 0x382   : > { %v1259_v45 = vld [vmem:[#allocation4 + $0x18] sm:$0xff] }
 0x383   : > { %v801_v58 = vpop.xlane.xlu1 %800 }
 0x384   : > { %v802_v25 = vadd.f32 %v801_v58, %v798_v54 }
 0x385   : > { %v1200_v59 = vld [vmem:[#allocation3 + $0x8] sm:$0xff] }
 0x386   : > { %804 = vst.msk [vmem:[#allocation3] sm:$0xff] %vm599_vm13, %v802_v25  ;;  %1782 = vrcp.f32 %v1200_v59  ;;  %v1212_v33 = vand.u32 2147483648, %v1200_v59  ;;  %v1210_v62 = vand.u32 2147483647, %v1200_v59  ;;  %vm1206_vm4 = vweird.f32 %v1200_v59 }
 0x388   : > { %v1213_v0 = vor.u32 1.1754944e-38, %v1212_v33  ;;  %vm1211_vm6 = vcmp.eq.f32.partialorder %v1210_v62, 8.507059e+37 }
 0x38c   : > { %v1783_v60 = vpop.eup %1782 }
 0x38d   : > { %v1202_v61 = vmul.f32 %v1783_v60, %v1200_v59  ;;  %vm1207_vm3 = vweird.f32 %v1783_v60  ;;  %v1178_v7 = vld [vmem:[#allocation3] sm:$0xff] }
 0x38e   : > { %vm1208_vm5 = vmor %vm1206_vm4, %vm1207_vm3  ;;  %1784 = vrcp.f32 %v1178_v7  ;;  %v1190_v40 = vand.u32 2147483648, %v1178_v7  ;;  %vm1184_vm12 = vweird.f32 %v1178_v7  ;;  %v1188_v35 = vand.u32 2147483647, %v1178_v7  ;;  %v1283_v59 = vld [vmem:[#allocation16] sm:$0xff] }
 0x38f   : > { %v1203_v29 = vsub.f32 1.0, %v1202_v61 }
 0x390   : > { %v1191_v38 = vor.u32 1.1754944e-38, %v1190_v40  ;;  %vm1189_vm14 = vcmp.eq.f32.partialorder %v1188_v35, 8.507059e+37 }
 0x391   : > { %v1204_v37 = vmul.f32 %v1783_v60, %v1203_v29 }
 0x393   : > { %v1205_v63 = vadd.f32 %v1783_v60, %v1204_v37 }
 0x394   : > { %v1785_v16 = vpop.eup %1784 }
 0x395   : > { %v1209_v1 = vsel %vm1208_vm5, %v1783_v60, %v1205_v63  ;;  %v1180_v19 = vmul.f32 %v1785_v16, %v1178_v7  ;;  %vm1185_vm11 = vweird.f32 %v1785_v16 }
 0x396   : > { %v1214_v2 = vsel %vm1211_vm6, %v1213_v0, %v1209_v1  ;;  %v1757_v1 = vld [vmem:[%s2668_s5] ss:$0 sm:$0xff] }
 0x397   : > { %1218 = vperm.xlu2 %1755, %v1214_v2   ;;  %v1181_v23 = vsub.f32 1.0, %v1180_v19 }
 0x399   : > { %v1182_v30 = vmul.f32 %v1785_v16, %v1181_v23 }
 0x39b   : > { %v1031_v13 = vpop.permute.xlu1 %1030  ;;  %v1183_v39 = vadd.f32 %v1785_v16, %v1182_v30 }
 0x39c   : > { %v1033_v17 = vmul.f32 %v1031_v13, %v1027_v12 }
 0x39f   : > { %808 = vperm.xlu2 %1755, %v1781_v50   ;;  %v1286_v50 = vld [vmem:[#allocation16 + $0x18] sm:$0xff] }
 0x3a0   : > { %1307 = vmatpush.msra.mxu1 %v1286_v50 }
 0x3a2   : > { %1308 = vmatpush.msra.mxu1 %v1285_v51 }
 0x3a4   : > { %1309 = vmatpush.msra.mxu1 %v1284_v52 }
 0x3a6   : > { %1310 = vmatpush.msra.mxu1 %v1283_v59 }
 0x3c8   : > { %v1023_v5 = vpop.xlane.xlu2 %1022 }
 0x3c9   : > { %v1024_v6 = vadd.f32 %v1023_v5, %v1020_v4 }
 0x3cb   : > { %1025 = vst.msk [vmem:[#allocation3 + $0x10] sm:$0xff] %vm599_vm13, %v1024_v6  ;;  %vm1186_vm13 = vmor %vm1184_vm12, %vm1185_vm11 }
 0x3cc   : > { %v1187_v36 = vsel %vm1186_vm13, %v1785_v16, %v1183_v39 }
 0x3cd   : > { %v1192_v41 = vsel %vm1189_vm14, %v1191_v38, %v1187_v36 }
 0x3d0   : > { %v918_v10 = vpop.permute.xlu2 %917 }
 0x3d1   : > { %v920_v11 = vmul.f32 %v918_v10, %v914_v8 }
 0x3d2   : > { %v1222_v57 = vld [vmem:[#allocation3 + $0x10] sm:$0xff] }
 0x3d3   : > { %v948_v14 = vadd.f32 %v945_v9, %v920_v11  ;;  %1786 = vrcp.f32 %v1222_v57  ;;  %v1234_v24 = vand.u32 2147483648, %v1222_v57  ;;  %v1232_v27 = vand.u32 2147483647, %v1222_v57 }
 0x3d4   : > { %vm1228_vm8 = vweird.f32 %v1222_v57 }
 0x3d5   : > { %949 = vst.msk [vmem:[#allocation4 + $0x8] sm:$0xff] %vm608_vm0, %v948_v14  ;;  %v1235_v31 = vor.u32 1.1754944e-38, %v1234_v24  ;;  %vm1233_vm10 = vcmp.eq.f32.partialorder %v1232_v27, 8.507059e+37 }
 0x3d7   : > { %v1057_v15 = vpop.f32.mrf.mxu3 }
 0x3d8   : > { %v1060_v18 = vadd.f32 %v1057_v15, %v1033_v17 }
 0x3d9   : > { %v1787_v20 = vpop.eup %1786 }
 0x3da   : > { %1061 = vst.msk [vmem:[#allocation4 + $0x10] sm:$0xff] %vm608_vm0, %v1060_v18  ;;  %v1224_v21 = vmul.f32 %v1787_v20, %v1222_v57  ;;  %vm1229_vm7 = vweird.f32 %v1787_v20 }
 0x3db   : > { %vm1230_vm9 = vmor %vm1228_vm8, %vm1229_vm7 }
 0x3dc   : > { %v1225_v22 = vsub.f32 1.0, %v1224_v21  ;;  %v1215_v43 = vld [vmem:[#allocation4 + $0x8] sm:$0xff] }
 0x3de   : > { %v1226_v26 = vmul.f32 %v1787_v20, %v1225_v22 }
 0x3e0   : > { %v1227_v28 = vadd.f32 %v1787_v20, %v1226_v26 }
 0x3e1   : > { %v1237_v54 = vld [vmem:[#allocation4 + $0x10] sm:$0xff] }
 0x3e2   : > { %v1231_v32 = vsel %vm1230_vm9, %v1787_v20, %v1227_v28 }
 0x3e3   : > { %v1236_v34 = vsel %vm1233_vm10, %v1235_v31, %v1231_v32 }
 0x3e4   : > { %1240 = vperm.xlu0 %1754, %v1236_v34  }
 0x3ec   : > { %1196 = vperm.xlu0 %1754, %v1192_v41  }
 0x3f1   : > { %v1219_v42 = vpop.permute.xlu2 %1218  ;;  %v1263_v44 = vpop.permute.xlu1 %1262 }
 0x3f2   : > { %v1221_v46 = vmul.f32 %v1219_v42, %v1215_v43  ;;  %v1265_v47 = vmul.f32 %v1263_v44, %v1259_v45 }
 0x3f4   : > { %1267 = vrot.lane.b32.xlu1 %v1221_v46, %s2123_s1  ;;  %1275 = vrot.lane.b32.xlu0 %v1265_v47, %s2124_s25 }
 0x3f9   : > { %v809_v53 = vpop.permute.xlu2 %808 }
 0x3fa   : > { %v811_v55 = vmul.f32 %v809_v53, %v805_v48 }
 0x3fc   : > { %v835_v56 = vadd.f32 %v2580_v49, %v811_v55 }
 0x3fe   : > { %836 = vst.msk [vmem:[#allocation4] sm:$0xff] %vm608_vm0, %v835_v56 }
 0x405   : > { %v1193_v61 = vld [vmem:[#allocation4] sm:$0xff] }
 0x456   : > { %v1241_v58 = vpop.permute.xlu0 %1240 }
 0x457   : > { %v1243_v25 = vmul.f32 %v1241_v58, %v1237_v54 }
 0x459   : > { %1271 = vrot.lane.b32.xlu2 %v1243_v25, %s2125_s30 }
 0x45e   : > { %v1197_v60 = vpop.permute.xlu0 %1196 }
 0x45f   : > { %v1199_v29 = vmul.f32 %v1197_v60, %v1193_v61 }
 0x466   : > { %v1268_v49 = vpop.permute.xlu1 %1267  ;;  %v1276_v62 = vpop.permute.xlu0 %1275 }
 0x467   : > { %v1278_v33 = vsel %vm608_vm0, %v1199_v29, %v1268_v49 }
 0x4b3   : > { %v1272_v37 = vpop.permute.xlu2 %1271 }
 0x4b4   : > { %v1280_v63 = vsel %vm1279_vm15, %v1278_v33, %v1272_v37 }
 0x4b5   : > { %v1282_v0 = vsel %vm1281_vm1, %v1280_v63, %v1276_v62 }
 0x4b6   : > { %1610 = vmatmul.msk.f32.vlgmr.msra.gmra.mxu1 %vm1291_vm2, %v1282_v0 }
 0x533   : > { %v1312_v2 = vpop.f32.mrf.mxu1 }
 0x534   : > { %v1313_v3 = vadd.f32 %v1757_v1, %v1312_v2 }
 0x536   : > { %1315 = vst.msk [vmem:[%s594_s21] sm:$0xff] %vm1291_vm2, %v1313_v3 }
 0x537   : > { %2025 = shalt.err (!%p2022_p13)
}
 0x538   : > { %1643 = dma.vmem_to_hbm [thread:$0]  (%p2263_p2), %s1331_s12, 128, %s1333_s0, %s1317_s4  }
 0x539 PF: > { %s2720_s17 = sld [smem:[#allocation32_spill]]  ;;  %p1675_p0 = pnand %p1546_p6, %p2270_p7 }
 0x53b   : > { %p1676_p4 = pneg %p1675_p0 }
 0x53f   : > { %s1344_s13 = sand.u32 1, %s2720_s17  }
 0x540   : > { %s1345_s1 = scalar_lea.sflag [#allocation8], %s1344_s13 }
 0x541   : > { %2083 = dma.done.wait (%p1676_p4), %s1345_s1, 128  }
 0x542   : > { %2085 = vsyncadd (%p1676_p4), %s1345_s1, 4294967168  ;;  %s35_s18 = sadd.s32 1, %s2108_s18   ;;  %s2722_s25 = sld [smem:[#allocation35_spill]] }
 0x543   : > { %p32_p9 = scmp.ge.s32.totalorder %s35_s18, 4   ;;  %s2723_s16 = sld [smem:[#allocation33_spill]] }
 0x544   : > { %s2724_s17 = sld [smem:[#allocation34_spill]]  ;;  %s2725_s13 = smov %s2092_s14 }
 0x545   : > { %s2726_s14 = smov %s2096_s15  ;;  %34 = sbr.rel (!%p32_p9) target bundleno = 21 (0x15), region = 184 }
 0x548   : > { %s2727_s15 = smov %s2722_s25 }
 0x54a   :  { %1351 = vsyncpa [#allocation7], 1 }
 0x54b   :  { %1353 = vsyncpa [#allocation7 + $0x1], 1 }
 0x54c   :  { %1354 = vsyncpa [#allocation12], 1 }
 0x54d   :  { %1356 = vsyncpa [#allocation12 + $0x1], 1 }
 0x54e   :  { %1357 = vsyncpa [#allocation15], 1 }
 0x54f   :  { %1359 = vsyncpa [#allocation15 + $0x1], 1 }
 0x550   :  { %1360 = vsyncpa [#allocation8], 1 }
 0x551   :  { %1362 = vsyncpa [#allocation8 + $0x1], 1 }
 0x552   :  { %1363 = vsyncpa [#allocation9], 1 }
 0x553   :  { %1365 = vsyncpa [#allocation9 + $0x1], 1 }
 0x554   :  { %1366 = vsyncpa [#allocation10], 1 }
 0x555   :  { %1368 = vsyncpa [#allocation10 + $0x1], 1 }
 0x556   :  { %1369 = vsyncpa [#allocation19], 1 }

</bundles_post_ra>
